<compile_context>
chip_gen: v7x
topology: tpu7x:2x2x1
jax: 0.10.0
libtpu: 0.0.40
codegen_flags: <defaults>
</compile_context>

<pallas_src>
import math

import jax
import jax.numpy as jnp
from jax import lax
from jax.experimental import pallas as pl
from jax.experimental.pallas import tpu as pltpu


# ------------------------- config (small, deterministic) -------------------------
B = 2           # batch
T = 8           # sequence length (== block_size)
C = 32          # n_embd
NH = 4          # n_head
HD = C // NH    # head dim = 8
BT = B * T      # 16 rows of x
R = NH * BT     # 64 stacked (head, batch, time) rows

_HIGH = jax.lax.Precision.HIGHEST

# power-of-two shifts used instead of vector integer division in the masks
_SH_BT = BT.bit_length() - 1    # log2(16) = 4
_SH_HD = HD.bit_length() - 1    # log2(8)  = 3
_SH_T = T.bit_length() - 1      # log2(8)  = 3
assert BT == 1 << _SH_BT and HD == 1 << _SH_HD and T == 1 << _SH_T


def self_attention_kernel(x_ref, w_ref, b_ref, o_ref):
    f32 = jnp.float32
    x = x_ref[...].astype(f32)          # (BT, C)
    w = w_ref[...].astype(f32)          # (C, 4C)  = [Wq | Wk | Wv | Wp]
    bias = b_ref[...].astype(f32)       # (1, 4C)  = [bq | bk | bv | bp]

    # ---- fused input projection: ONE matmul gives q|k|v (lanes 96:128 unused) ----
    qkv = jnp.dot(x, w, preferred_element_type=f32, precision=_HIGH) + bias   # (BT, 4C)
    q = qkv[:, 0 * C:1 * C]             # (BT, C)  static lane slices
    k = qkv[:, 1 * C:2 * C]
    v = qkv[:, 2 * C:3 * C]
    wp = w[:, 3 * C:4 * C]              # (C, C)
    bp = bias[:, 3 * C:4 * C]           # (1, C)

    # ---- block-diagonal attention over all B*NH (batch, head) pairs at once ----
    # Stacked row index r = h*(B*T) + b*T + t.  Row-group h keeps only head-h lanes.
    row_r = lax.broadcasted_iota(jnp.int32, (R, C), 0)
    col_c = lax.broadcasted_iota(jnp.int32, (R, C), 1)
    head_lanes = (row_r >> _SH_BT) == (col_c >> _SH_HD)        # r//(B*T) == lane//HD

    q_big = jnp.where(head_lanes, jnp.concatenate([q] * NH, axis=0), 0.0)   # (R, C)
    k_big = jnp.concatenate([k] * NH, axis=0)   # masking q alone selects head-h lanes
    v_big = jnp.where(head_lanes, jnp.concatenate([v] * NH, axis=0), 0.0)   # (R, C)

    scale = 1.0 / math.sqrt(HD)
    s = lax.dot_general(q_big, k_big, (((1,), (1,)), ((), ())),             # q @ k^T
                        preferred_element_type=f32, precision=_HIGH) * scale  # (R, R)

    # keep iff same (head, batch) block of T rows AND causal (t' <= t)
    ri = lax.broadcasted_iota(jnp.int32, (R, R), 0)
    ci = lax.broadcasted_iota(jnp.int32, (R, R), 1)
    keep = ((ri >> _SH_T) == (ci >> _SH_T)) & (ri >= ci)
    s = jnp.where(keep, s, -1e30)               # exp() underflows to exactly 0

    m = jnp.max(s, axis=-1, keepdims=True)
    e = jnp.exp(s - m)
    p = e / jnp.sum(e, axis=-1, keepdims=True)  # EXACT divide (approx recip was the bug)

    y_big = jnp.dot(p, v_big, preferred_element_type=f32, precision=_HIGH)  # (R, C)
    # Row-group h of y_big holds y_h in head-h lanes only, so y_big @ Wp gives the
    # per-head contribution y_h @ Wp[h*HD:(h+1)*HD, :]; summing the groups merges heads.
    yp = jnp.dot(y_big, wp, preferred_element_type=f32, precision=_HIGH)    # (R, C)

    acc = yp[0:BT]
    for h in range(1, NH):
        acc = acc + yp[h * BT:(h + 1) * BT]     # static sublane slices, no concat
    o_ref[...] = (acc + bp).astype(o_ref.dtype)  # single store


def self_attention_forward(x, params):
    Bq, Tq, Cq = x.shape
    assert (Bq, Tq, Cq) == (B, T, C)

    # Pack ALL parameters into one lane-dense (C, 4C)=(32,128) weight slab and one
    # (1, 4C) bias row (done once wrapper-side; in a real model at param-load time).
    # Weights are stored (in, out) == PyTorch weight.T, so y = x @ W + b.
    w_packed = jnp.concatenate(
        [params["wq"], params["wk"], params["wv"], params["wp"]], axis=1)          # (C, 4C)
    b_packed = jnp.concatenate(
        [params["bq"], params["bk"], params["bv"], params["bp"]]).reshape(1, 4 * Cq)

    x2 = x.reshape(Bq * Tq, Cq)                                                     # fold batch

    out2 = pl.pallas_call(
        self_attention_kernel,
        out_shape=jax.ShapeDtypeStruct((Bq * Tq, Cq), x.dtype),
        grid_spec=pltpu.PrefetchScalarGridSpec(
            num_scalar_prefetch=0,
            grid=(1,),                                     # single step, everything in VMEM
            in_specs=[
                pl.BlockSpec((Bq * Tq, Cq), lambda i: (0, 0)),
                pl.BlockSpec((Cq, 4 * Cq), lambda i: (0, 0)),
                pl.BlockSpec((1, 4 * Cq), lambda i: (0, 0)),
            ],
            out_specs=pl.BlockSpec((Bq * Tq, Cq), lambda i: (0, 0)),
        ),
        compiler_params=pltpu.CompilerParams(
            dimension_semantics=("arbitrary",),            # don't shard a 1-step grid across TCs
        ),
    )(x2, w_packed, b_packed)

    return out2.reshape(Bq, Tq, Cq)


# ------------------ pure-JAX reference (PyTorch-faithful, eval mode) ------------------
def self_attention_reference(x, params):
    with jax.default_matmul_precision("highest"):
        B_, T_, C_ = x.shape
        k = x @ params["wk"] + params["bk"]
        q = x @ params["wq"] + params["bq"]
        v = x @ params["wv"] + params["bv"]
        k = k.reshape(B_, T_, NH, HD).transpose(0, 2, 1, 3)
        q = q.reshape(B_, T_, NH, HD).transpose(0, 2, 1, 3)
        v = v.reshape(B_, T_, NH, HD).transpose(0, 2, 1, 3)
        att = jnp.einsum("bhqd,bhkd->bhqk", q, k) * (1.0 / math.sqrt(HD))
        mask = jnp.tril(jnp.ones((T_, T_), dtype=bool))
        att = jnp.where(mask[None, None], att, -jnp.inf)
        att = jax.nn.softmax(att, axis=-1)
        y = jnp.einsum("bhqk,bhkd->bhqd", att, v)
        y = y.transpose(0, 2, 1, 3).reshape(B_, T_, C_)
        return y @ params["wp"] + params["bp"]


def make_params(seed=0):
    ks = jax.random.split(jax.random.PRNGKey(seed), 8)
    sw, sb = 0.15, 0.05
    f32 = jnp.float32
    return {
        "wq": (sw * jax.random.normal(ks[0], (C, C))).astype(f32),
        "bq": (sb * jax.random.normal(ks[1], (C,))).astype(f32),
        "wk": (sw * jax.random.normal(ks[2], (C, C))).astype(f32),
        "bk": (sb * jax.random.normal(ks[3], (C,))).astype(f32),
        "wv": (sw * jax.random.normal(ks[4], (C, C))).astype(f32),
        "bv": (sb * jax.random.normal(ks[5], (C,))).astype(f32),
        "wp": (sw * jax.random.normal(ks[6], (C, C))).astype(f32),
        "bp": (sb * jax.random.normal(ks[7], (C,))).astype(f32),
    }


if __name__ == "__main__":
    root = jax.random.PRNGKey(0)
    kx, _ = jax.random.split(root, 2)
    x = jax.random.normal(kx, (B, T, C), dtype=jnp.float32)
    params = make_params(0)

    out = self_attention_forward(x, params)
    out = jax.block_until_ready(out)

    ref = self_attention_reference(x, params)
    assert out.shape == (B, T, C)
    max_err = jnp.max(jnp.abs(out - ref))
    # With exact softmax division + precision=HIGHEST matmuls the observed error is
    # ~1e-6; the tolerance below only leaves headroom for MXU pass-precision modes
    # while still catching any real masking / fusion bug (those would be >> 1e-2).
    assert jnp.allclose(out, ref, rtol=2e-3, atol=3e-3), (
        f"mismatch vs pure-JAX reference (max abs err {max_err})"
    )
    print("KERNEL_OK")
</pallas_src>

<mosaic_0001>
module attributes {stable_mosaic.version = 11 : i64} {
  func.func @self_attention_kernel(%arg0: i32, %arg1: memref<16x32xf32, #tpu.memory_space<vmem>>, %arg2: memref<32x128xf32, #tpu.memory_space<vmem>>, %arg3: memref<1x128xf32, #tpu.memory_space<vmem>>, %arg4: memref<16x32xf32, #tpu.memory_space<vmem>>) attributes {dimension_semantics = [#tpu.dimension_semantics<arbitrary>], iteration_bounds = array<i64: 1>, scalar_prefetch = 0 : i64, scratch_operands = 0 : i64, tpu.core_type = #tpu.core_type<tc>, window_params = [{pipeline_mode = #tpu.pipeline_mode<synchronous>, transform_indices = @transform_0, window_bounds = array<i64: 16, 32>}, {pipeline_mode = #tpu.pipeline_mode<synchronous>, transform_indices = @transform_1, window_bounds = array<i64: 32, 128>}, {pipeline_mode = #tpu.pipeline_mode<synchronous>, transform_indices = @transform_2, window_bounds = array<i64: 1, 128>}, {pipeline_mode = #tpu.pipeline_mode<synchronous>, transform_indices = @transform_3, window_bounds = array<i64: 16, 32>}]} {
    %c0 = arith.constant 0 : index
    %c0_0 = arith.constant 0 : index
    %0 = vector.load %arg1[%c0, %c0_0] : memref<16x32xf32, #tpu.memory_space<vmem>>, vector<16x32xf32>
    %c0_1 = arith.constant 0 : index
    %c0_2 = arith.constant 0 : index
    %1 = vector.load %arg2[%c0_1, %c0_2] : memref<32x128xf32, #tpu.memory_space<vmem>>, vector<32x128xf32>
    %c0_3 = arith.constant 0 : index
    %c0_4 = arith.constant 0 : index
    %2 = vector.load %arg3[%c0_3, %c0_4] : memref<1x128xf32, #tpu.memory_space<vmem>>, vector<1x128xf32>
    %cst = arith.constant dense<0.000000e+00> : vector<16x128xf32>
    %3 = tpu.matmul %0, %1, %cst {dimension_numbers = #tpu.dot_dimension_numbers<[1], [0], [0], [1], [0, 0, 1, 1], [], []>, precision = #tpu.contract_precision<fp32>} : vector<16x32xf32>, vector<32x128xf32>, vector<16x128xf32> -> vector<16x128xf32>
    %4 = vector.broadcast %2 : vector<1x128xf32> to vector<16x128xf32>
    %5 = arith.addf %3, %4 : vector<16x128xf32>
    %6 = vector.extract_strided_slice %5 {offsets = [0, 0], sizes = [16, 32], strides = [1, 1]} : vector<16x128xf32> to vector<16x32xf32>
    %7 = vector.extract_strided_slice %5 {offsets = [0, 32], sizes = [16, 32], strides = [1, 1]} : vector<16x128xf32> to vector<16x32xf32>
    %8 = vector.extract_strided_slice %5 {offsets = [0, 64], sizes = [16, 32], strides = [1, 1]} : vector<16x128xf32> to vector<16x32xf32>
    %9 = vector.extract_strided_slice %1 {offsets = [0, 96], sizes = [32, 32], strides = [1, 1]} : vector<32x128xf32> to vector<32x32xf32>
    %10 = vector.extract_strided_slice %2 {offsets = [0, 96], sizes = [1, 32], strides = [1, 1]} : vector<1x128xf32> to vector<1x32xf32>
    %11 = tpu.iota {dimensions = array<i32: 0>} : vector<64x32xi32>
    %12 = tpu.iota {dimensions = array<i32: 1>} : vector<64x32xi32>
    %c4_i32 = arith.constant 4 : i32
    %13 = vector.broadcast %c4_i32 : i32 to vector<64x32xi32>
    %14 = arith.shrsi %11, %13 : vector<64x32xi32>
    %c3_i32 = arith.constant 3 : i32
    %15 = vector.broadcast %c3_i32 : i32 to vector<64x32xi32>
    %16 = arith.shrsi %12, %15 : vector<64x32xi32>
    %17 = arith.cmpi eq, %14, %16 : vector<64x32xi32>
    %18 = tpu.concatenate %6, %6, %6, %6 in 0 : vector<16x32xf32>, vector<16x32xf32>, vector<16x32xf32>, vector<16x32xf32> -> vector<64x32xf32>
    %cst_5 = arith.constant 0.000000e+00 : f32
    %19 = vector.broadcast %cst_5 : f32 to vector<64x32xf32>
    %20 = arith.select %17, %18, %19 : vector<64x32xi1>, vector<64x32xf32>
    %21 = tpu.concatenate %7, %7, %7, %7 in 0 : vector<16x32xf32>, vector<16x32xf32>, vector<16x32xf32>, vector<16x32xf32> -> vector<64x32xf32>
    %22 = tpu.concatenate %8, %8, %8, %8 in 0 : vector<16x32xf32>, vector<16x32xf32>, vector<16x32xf32>, vector<16x32xf32> -> vector<64x32xf32>
    %cst_6 = arith.constant 0.000000e+00 : f32
    %23 = vector.broadcast %cst_6 : f32 to vector<64x32xf32>
    %24 = arith.select %17, %22, %23 : vector<64x32xi1>, vector<64x32xf32>
    %cst_7 = arith.constant dense<0.000000e+00> : vector<64x64xf32>
    %25 = tpu.matmul %20, %21, %cst_7 {dimension_numbers = #tpu.dot_dimension_numbers<[1], [1], [0], [0], [0, 0, 1, 0], [], []>, precision = #tpu.contract_precision<fp32>} : vector<64x32xf32>, vector<64x32xf32>, vector<64x64xf32> -> vector<64x64xf32>
    %cst_8 = arith.constant 0.353553385 : f32
    %26 = vector.broadcast %cst_8 : f32 to vector<64x64xf32>
    %27 = arith.mulf %25, %26 : vector<64x64xf32>
    %28 = tpu.iota {dimensions = array<i32: 0>} : vector<64x64xi32>
    %29 = tpu.iota {dimensions = array<i32: 1>} : vector<64x64xi32>
    %c3_i32_9 = arith.constant 3 : i32
    %30 = vector.broadcast %c3_i32_9 : i32 to vector<64x64xi32>
    %31 = arith.shrsi %28, %30 : vector<64x64xi32>
    %c3_i32_10 = arith.constant 3 : i32
    %32 = vector.broadcast %c3_i32_10 : i32 to vector<64x64xi32>
    %33 = arith.shrsi %29, %32 : vector<64x64xi32>
    %34 = arith.cmpi eq, %31, %33 : vector<64x64xi32>
    %35 = arith.cmpi sge, %28, %29 : vector<64x64xi32>
    %36 = arith.andi %34, %35 : vector<64x64xi1>
    %cst_11 = arith.constant -1.000000e+30 : f32
    %37 = vector.broadcast %cst_11 : f32 to vector<64x64xf32>
    %38 = arith.select %36, %27, %37 : vector<64x64xi1>, vector<64x64xf32>
    %cst_12 = arith.constant dense<0xFF800000> : vector<64xf32>
    %39 = vector.multi_reduction <maximumf>, %38, %cst_12 [1] : vector<64x64xf32> to vector<64xf32>
    %40 = vector.shape_cast %39 : vector<64xf32> to vector<64x1xf32>
    %41 = vector.broadcast %40 : vector<64x1xf32> to vector<64x64xf32>
    %42 = arith.subf %38, %41 : vector<64x64xf32>
    %43 = math.exp %42 : vector<64x64xf32>
    %cst_13 = arith.constant dense<0.000000e+00> : vector<64xf32>
    %44 = vector.multi_reduction <add>, %43, %cst_13 [1] : vector<64x64xf32> to vector<64xf32>
    %45 = vector.shape_cast %44 : vector<64xf32> to vector<64x1xf32>
    %46 = vector.broadcast %45 : vector<64x1xf32> to vector<64x64xf32>
    %47 = arith.divf %43, %46 : vector<64x64xf32>
    %cst_14 = arith.constant dense<0.000000e+00> : vector<64x32xf32>
    %48 = tpu.matmul %47, %24, %cst_14 {dimension_numbers = #tpu.dot_dimension_numbers<[1], [0], [0], [1], [0, 0, 1, 1], [], []>, precision = #tpu.contract_precision<fp32>} : vector<64x64xf32>, vector<64x32xf32>, vector<64x32xf32> -> vector<64x32xf32>
    %cst_15 = arith.constant dense<0.000000e+00> : vector<64x32xf32>
    %49 = tpu.matmul %48, %9, %cst_15 {dimension_numbers = #tpu.dot_dimension_numbers<[1], [0], [0], [1], [0, 0, 1, 1], [], []>, precision = #tpu.contract_precision<fp32>} : vector<64x32xf32>, vector<32x32xf32>, vector<64x32xf32> -> vector<64x32xf32>
    %50 = vector.extract_strided_slice %49 {offsets = [0, 0], sizes = [16, 32], strides = [1, 1]} : vector<64x32xf32> to vector<16x32xf32>
    %51 = vector.extract_strided_slice %49 {offsets = [16, 0], sizes = [16, 32], strides = [1, 1]} : vector<64x32xf32> to vector<16x32xf32>
    %52 = arith.addf %50, %51 : vector<16x32xf32>
    %53 = vector.extract_strided_slice %49 {offsets = [32, 0], sizes = [16, 32], strides = [1, 1]} : vector<64x32xf32> to vector<16x32xf32>
    %54 = arith.addf %52, %53 : vector<16x32xf32>
    %55 = vector.extract_strided_slice %49 {offsets = [48, 0], sizes = [16, 32], strides = [1, 1]} : vector<64x32xf32> to vector<16x32xf32>
    %56 = arith.addf %54, %55 : vector<16x32xf32>
    %57 = vector.broadcast %10 : vector<1x32xf32> to vector<16x32xf32>
    %58 = arith.addf %56, %57 : vector<16x32xf32>
    %c0_16 = arith.constant 0 : index
    %c0_17 = arith.constant 0 : index
    %59 = vector.load %arg4[%c0_16, %c0_17] : memref<16x32xf32, #tpu.memory_space<vmem>>, vector<16x32xf32>
    tpu.vector_store %arg4[%c0_16, %c0_17], %58 {strides = array<i32>} : memref<16x32xf32, #tpu.memory_space<vmem>>, vector<16x32xf32>,
    return
  }
  func.func @transform_0(%arg0: i32) -> (i32, i32) {
    %c0_i32 = arith.constant 0 : i32
    %c0_i32_0 = arith.constant 0 : i32
    %c0_i32_1 = arith.constant 0 : i32
    return %c0_i32, %c0_i32_0 : i32, i32
  }
  func.func @transform_1(%arg0: i32) -> (i32, i32) {
    %c0_i32 = arith.constant 0 : i32
    %c0_i32_0 = arith.constant 0 : i32
    %c0_i32_1 = arith.constant 0 : i32
    return %c0_i32, %c0_i32_0 : i32, i32
  }
  func.func @transform_2(%arg0: i32) -> (i32, i32) {
    %c0_i32 = arith.constant 0 : i32
    %c0_i32_0 = arith.constant 0 : i32
    %c0_i32_1 = arith.constant 0 : i32
    return %c0_i32, %c0_i32_0 : i32, i32
  }
  func.func @transform_3(%arg0: i32) -> (i32, i32) {
    %c0_i32 = arith.constant 0 : i32
    %c0_i32_0 = arith.constant 0 : i32
    %c0_i32_1 = arith.constant 0 : i32
    return %c0_i32, %c0_i32_0 : i32, i32
  }
}

</mosaic_0001>

<bundles_post_ra>
// kernel: tpu_custom_call.1
= control target key start
LH: loop header
LB: loop body
LE: loop exit
PB: predicated region body
PF: predicated region fallthrough
CT: control target
= control target key end

     0   :  { %8 = vsyncpa [#allocation3], 0  ;;  %s5531_s0 = inlined_call_operand.hbm [shape: f32[16,32], index: 0, kind: input, shape index: {}]   ;;  %s5532_s1 = inlined_call_operand.hbm [shape: f32[32,128], index: 1, kind: input, shape index: {}]   ;;  %s5533_s2 = inlined_call_operand.vmem [shape: f32[1,128], index: 2, kind: input, shape index: {}]   ;;  %s5534_s3 = inlined_call_operand.hbm [shape: f32[16,32], index: 3, kind: output, shape index: {}]  }
   0x1   :  { %9 = vsyncpa [#allocation6], 0 }
   0x2   :  { %10 = vsyncpa [#allocation4], 0  ;;  %s4730_s12 = smov [#allocation2]   ;;  %s4658_s16 = scalar_lea.hbm %s5531_s0, 256 }
   0x3   :  { %s16_s13 = sshll.u32 %s4730_s12, 4  ;;  %p4659_p0 = scmp.ne.s32.totalorder %s5531_s0, %s4658_s16  ;;  %s17_s13 = int_to_ptr.vmem [resolvable:$true] %s16_s13 }
   0x4   :  { %p4662_p1 = scmp.lt.u32.totalorder %s4658_s16, %s5531_s0 }
   0x6   :  { %p4664_p2 = pnand %p4662_p1, %p4659_p0 }
   0x8   :  { %4667 = shalt.err (!%p4664_p2)
}
   0x9   :  { %s4668_s21 = scalar_lea.vmem %s17_s13, 256  ;;  %p4673_p4 = scmp.lt.s32.totalorder %s17_s13, %s17_s13 }
   0xa   :  { %p4669_p3 = scmp.ne.s32.totalorder %s17_s13, %s4668_s21  ;;  %p4674_p5 = scmp.lt.s32.totalorder %s4668_s21, %s4668_s21 }
   0xc   :  { %p4675_p6 = por %p4674_p5, %p4673_p4 }
   0xe   :  { %p4676_p7 = pnand %p4675_p6, %p4669_p3 }
  0x10   :  { %4679 = shalt.err (!%p4676_p7)
}
  0x11   :  { %s4731_s22 = smov 128   ;;  %s4732_s23 = smov 8  }
  0x12   :  { %22 = dma.hbm_to_vmem [thread:$0]  %s5531_s0, 256, %s17_s13, [#allocation3], %s4731_s22, %s4731_s22, %s4732_s23  }
  0x13   :  { %s4733_s26 = smov [#allocation5]   ;;  %s4680_s30 = scalar_lea.hbm %s5532_s1, 512 }
  0x14   :  { %s28_s27 = sshll.u32 %s4733_s26, 4  ;;  %p4681_p8 = scmp.ne.s32.totalorder %s5532_s1, %s4680_s30  ;;  %s29_s27 = int_to_ptr.vmem [resolvable:$true] %s28_s27 }
  0x15   :  { %p4684_p9 = scmp.lt.u32.totalorder %s4680_s30, %s5532_s1 }
  0x17   :  { %p4686_p10 = pnand %p4684_p9, %p4681_p8 }
  0x19   :  { %4689 = shalt.err (!%p4686_p10)
}
  0x1a   :  { %s4690_s8 = scalar_lea.vmem %s29_s27, 512  ;;  %p4695_p12 = scmp.lt.s32.totalorder %s29_s27, %s29_s27 }
  0x1b   :  { %p4691_p11 = scmp.ne.s32.totalorder %s29_s27, %s4690_s8  ;;  %p4696_p13 = scmp.lt.s32.totalorder %s4690_s8, %s4690_s8 }
  0x1d   :  { %p4697_p0 = por %p4696_p13, %p4695_p12 }
  0x1f   :  { %p4698_p1 = pnand %p4697_p0, %p4691_p11 }
  0x21   :  { %4701 = shalt.err (!%p4698_p1)
}
  0x22   :  { %34 = dma.hbm_to_vmem [thread:$0]  %s5532_s1, 512, %s29_s27, [#allocation6], %s4731_s22, %s4731_s22, %s4732_s23  }
  0x23   :  { %4724 = dma.done.wait [#allocation3], 256  }
  0x24   :  { %4725 = vsyncadd [#allocation3], 4294967040 }
  0x25   :  { %4726 = dma.done.wait [#allocation6], 512  }
  0x26   :  { %4727 = vsyncadd [#allocation6], 4294966784  ;;  %vm5535_vm0 = vcmask 261120   ;;  %v4788_v0 = vld [vmem:[#allocation5] sm:$0xff]  ;;  %v4790_v1 = vld [vmem:[#allocation5 + $0x8] sm:$0xff]  ;;  %v591_v48 = vlaneseq  ;;  %vm1561_vm14 = vcmask 523264  }
  0x27   :  { %v4792_v2 = vld [vmem:[#allocation5 + $0x10] sm:$0xff]  ;;  %v64_v3 = vand.u32 4294901760, %v4788_v0  ;;  %v67_v4 = vand.u32 4294901760, %v4790_v1  ;;  %v4796_v5 = vld [vmem:[#allocation5 + $0x18] sm:$0xff]  ;;  %s4735_s11 = smov 64   ;;  %s4736_s12 = smov 32  }
  0x28   :  { %v70_v6 = vand.u32 4294901760, %v4792_v2  ;;  %v43_v7 = vld [vmem:[#allocation2] sm:$0xff]  ;;  %v44_v8 = vld [vmem:[#allocation2 + $0x8] sm:$0xff]  ;;  %v73_v9 = vand.u32 4294901760, %v4796_v5  ;;  %v4814_v49 = vand.u32 127, %v591_v48  ;;  %v4821_v51 = vshrl.u32 %v591_v48, 7 }
  0x29   :  { %v58_v10 = vsel %vm5535_vm0, %v43_v7, 0  ;;  %v61_v11 = vsel %vm5535_vm0, %v44_v8, 0  ;;  %v4802_v12 = vpack.c.bf16 %v67_v4, %v64_v3  ;;  %v154_v13 = vsub.f32 %v4788_v0, %v64_v3  ;;  %v4819_v50 = vld [vmem:[%s5533_s2] ss:$0 sm:$0xff]  ;;  %s4734_s2 = smov 96   ;;  %s4737_s13 = smov [#allocation7]  }
  0x2a   :  { %v161_v14 = vsub.f32 %v4790_v1, %v67_v4  ;;  %v168_v15 = vsub.f32 %v4792_v2, %v70_v6  ;;  %v175_v16 = vsub.f32 %v4796_v5, %v73_v9  ;;  %v132_v17 = vand.u32 4294901760, %v58_v10  ;;  %s3356_s14 = sshll.u32 %s4737_s13, 4  ;;  %s3357_s14 = int_to_ptr.vmem [resolvable:$true] %s3356_s14 }
  0x2b   :  { %v142_v18 = vand.u32 4294901760, %v61_v11  ;;  %v155_v19 = vand.u32 4294901760, %v154_v13  ;;  %v4196_v21 = vpack.c.bf16 %v73_v9, %v70_v6  ;;  %4193 = vmatprep.subr.bf16.mxu1 %v4802_v12  ;;  %v602_v53 = vshra.s32 %v4821_v51, 4  ;;  %s4702_s15 = scalar_lea.vmem %s3357_s14, 256  ;;  %p4707_p3 = scmp.lt.s32.totalorder %s3357_s14, %s3357_s14 }
  0x2c   :  { %v162_v20 = vand.u32 4294901760, %v161_v14  ;;  %v169_v22 = vand.u32 4294901760, %v168_v15  ;;  %v176_v23 = vand.u32 4294901760, %v175_v16  ;;  %3689 = vmatprep.mubr.f32.mxu0 %v132_v17  ;;  %v133_v24 = vsub.f32 %v58_v10, %v132_v17  ;;  %4195 = vmatpush3.bf16.msra.mxu1 %v4802_v12  ;;  %p4703_p2 = scmp.ne.s32.totalorder %s3357_s14, %s4702_s15  ;;  %p4708_p4 = scmp.lt.s32.totalorder %s4702_s15, %s4702_s15 }
  0x2d   :  { %v143_v25 = vsub.f32 %v61_v11, %v142_v18  ;;  %v156_v26 = vsub.f32 %v154_v13, %v155_v19  ;;  %4197 = vmatprep.subr.bf16.mxu1 %v4196_v21  ;;  %v4208_v42 = vpack.c.bf16 %v161_v14, %v154_v13  ;;  %v4212_v43 = vpack.c.bf16 %v175_v16, %v168_v15 }
  0x2e   :  { %v163_v27 = vsub.f32 %v161_v14, %v162_v20  ;;  %v170_v28 = vsub.f32 %v168_v15, %v169_v22  ;;  %v177_v29 = vsub.f32 %v175_v16, %v176_v23  ;;  %v134_v30 = vand.u32 4294901760, %v133_v24  ;;  %p4709_p5 = por %p4708_p4, %p4707_p3 }
  0x2f   :  { %v144_v31 = vand.u32 4294901760, %v143_v25  ;;  %v157_v32 = vand.u32 4294901760, %v156_v26  ;;  %v4224_v44 = vpack.c.bf16 %v162_v20, %v155_v19  ;;  %v4228_v45 = vpack.c.bf16 %v176_v23, %v169_v22 }
  0x30   :  { %v164_v33 = vand.u32 4294901760, %v163_v27  ;;  %v171_v34 = vand.u32 4294901760, %v170_v28  ;;  %v178_v35 = vand.u32 4294901760, %v177_v29  ;;  %4199 = vmatpush3.bf16.msra.mxu1 %v4196_v21  ;;  %v135_v36 = vsub.f32 %v133_v24, %v134_v30  ;;  %p4710_p6 = pnand %p4709_p5, %p4703_p2 }
  0x31   :  { %v145_v37 = vsub.f32 %v143_v25, %v144_v31  ;;  %v4826_v54 = vshra.s32 %v4814_v49, 3  ;;  %v4858_v15 = vadd.s32 8, %v4821_v51  ;;  %v4873_v22 = vadd.s32 24, %v4821_v51 }
  0x32   :  { %v4200_v38 = vpack.c.bf16 %v164_v33, %v157_v32  ;;  %v4204_v39 = vpack.c.bf16 %v178_v35, %v171_v34  ;;  %v136_v40 = vand.u32 4294901760, %v135_v36  ;;  %v4889_v28 = vadd.s32 40, %v4821_v51 }
  0x33   :  { %v146_v41 = vand.u32 4294901760, %v145_v37  ;;  %vm4832_vm1 = vcmp.eq.s32.totalorder %v602_v53, %v4826_v54  ;;  %v605_v27 = vshra.s32 %v4873_v22, 4  ;;  %v5543_v29 = vmov 0 }
  0x34   :  { %4201 = vmatprep.subr.bf16.mxu0 %v4200_v38  ;;  %3678 = vmatprep.mubr.f32.mxu1 %v136_v40  ;;  %v607_v35 = vshra.s32 %v4889_v28, 4  ;;  %v4914_v36 = vadd.s32 56, %v4821_v51  ;;  %v5547_v37 = vmov 0  ;;  %vm1538_vm10 = vcmp.ge.s32.totalorder %v4858_v15, %v4814_v49 }
  0x35   :  { %4203 = vmatpush3.bf16.msra.mxu0 %v4200_v38  ;;  %3679 = vmatmul.mubr.f32.vlgmr.msra.gmra.mrb[0].mxu1 %v146_v41  ;;  %vm4908_vm4 = vcmp.eq.s32.totalorder %v605_v27, %v4826_v54  ;;  %vm1537_vm12 = vcmp.ge.s32.totalorder %v4821_v51, %v4814_v49 }
  0x36   :  { %4205 = vmatprep.subr.bf16.mxu0 %v4204_v39  ;;  %vm4932_vm6 = vcmp.eq.s32.totalorder %v607_v35, %v4826_v54 }
  0x39   :  { %4207 = vmatpush3.bf16.msra.mxu0 %v4204_v39 }
  0x3a   :  { %4209 = vmatprep.subr.bf16.mxu0 %v4208_v42 }
  0x3c   :  { %3690 = vmatmul.mubr.f32.vlgmr.msra.gmra.mrb[0].mxu0 %v142_v18 }
  0x3d   :  { %4211 = vmatpush3.bf16.msra.mxu0 %v4208_v42  ;;  %3700 = vmatprep.mubr.f32.mxu0 %v133_v24 }
  0x3e   :  { %4213 = vmatprep.subr.bf16.mxu0 %v4212_v43 }
  0x41   :  { %4215 = vmatpush3.bf16.msra.mxu0 %v4212_v43 }
  0x42   :  { %4217 = vmatprep.subr.bf16.mxu0 %v4802_v12 }
  0x44   :  { %3701 = vmatmul.mubr.f32.vlgmr.msra.gmra.mrb[0].mxu0 %v143_v25  ;;  %v4880_v25 = vadd.s32 32, %v4821_v51 }
  0x45   :  { %4219 = vmatpush3.bf16.msra.mxu0 %v4802_v12  ;;  %3711 = vmatprep.mubr.f32.mxu0 %v134_v30 }
  0x46   :  { %4221 = vmatprep.subr.bf16.mxu0 %v4196_v21  ;;  %v606_v30 = vshra.s32 %v4880_v25, 4 }
  0x48   :  { %vm4918_vm5 = vcmp.eq.s32.totalorder %v606_v30, %v4826_v54 }
  0x49   :  { %4223 = vmatpush3.bf16.msra.mxu0 %v4196_v21  ;;  %v5548_v37 = vsel %vm4918_vm5, 4294967295, %v5547_v37 }
  0x4a   :  { %4225 = vmatprep.subr.bf16.mxu0 %v4224_v44 }
  0x4c   :  { %3712 = vmatmul.mubr.f32.vlgmr.msra.gmra.mrb[0].mxu0 %v144_v31  ;;  %v4898_v31 = vadd.s32 48, %v4821_v51 }
  0x4d   :  { %4227 = vmatpush3.bf16.msra.mxu0 %v4224_v44  ;;  %3722 = vmatprep.mubr.f32.mxu0 %v132_v17  ;;  %v609_v44 = vshra.s32 %v4914_v36, 4 }
  0x4e   :  { %4229 = vmatprep.subr.bf16.mxu0 %v4228_v45  ;;  %v608_v38 = vshra.s32 %v4898_v31, 4 }
  0x4f   :  { %vm4957_vm8 = vcmp.eq.s32.totalorder %v609_v44, %v4826_v54 }
  0x50   :  { %vm4940_vm7 = vcmp.eq.s32.totalorder %v608_v38, %v4826_v54 }
  0x51   :  { %4231 = vmatpush3.bf16.msra.mxu0 %v4228_v45 }
  0x52   :  { %4233 = vmatprep.subr.bf16.mxu0 %v4802_v12 }
  0x54   :  { %3723 = vmatmul.mubr.f32.vlgmr.msra.gmra.mrb[0].mxu0 %v142_v18 }
  0x55   :  { %4235 = vmatpush3.bf16.msra.mxu0 %v4802_v12  ;;  %3733 = vmatprep.mubr.f32.mxu0 %v132_v17 }
  0x56   :  { %4237 = vmatprep.subr.bf16.mxu0 %v4196_v21 }
  0x59   :  { %4239 = vmatpush3.bf16.msra.mxu0 %v4196_v21  ;;  %v603_v21 = vshra.s32 %v4858_v15, 4 }
  0x5b   :  { %vm4883_vm2 = vcmp.eq.s32.totalorder %v603_v21, %v4826_v54 }
  0x5c   :  { %3734 = vmatmul.mubr.f32.vlgmr.msra.gmra.mrb[0].mxu0 %v142_v18  ;;  %v4865_v18 = vadd.s32 16, %v4821_v51 }
  0x5e   :  { %v604_v24 = vshra.s32 %v4865_v18, 4 }
  0x60   :  { %vm4892_vm3 = vcmp.eq.s32.totalorder %v604_v24, %v4826_v54 }
  0x61   :  { %v5544_v29 = vsel %vm4892_vm3, 4294967295, %v5543_v29 }
 0x108   :  { %v3680_v46 = vpop.f32.mrb[0].mxu1 }
 0x109   :  { %v138_v47 = vpop.f32.mrb[1].mxu1  ;;  %v149_v52 = vadd.f32 %v3680_v46, %v4819_v50  ;;  %v5551_v46 = vmov 0 }
 0x10a   :  { %v139_v55 = vadd.f32 %v4819_v50, %v138_v47  ;;  %v5552_v46 = vsel %vm4940_vm7, 4294967295, %v5551_v46 }
 0x12f   :  { %v3735_v56 = vpop.f32.mrb[0].mxu0 }
 0x130   :  { %v4829_v57 = vadd.f32 %v3735_v56, %v149_v52  ;;  %v581_v58 = vpop.f32.mrb[1].mxu0 }
 0x131   :  { %v4836_v60 = vadd.f32 %v581_v58, %v139_v55 }
 0x132   :  { %v620_v32 = vsel %vm4883_vm2, %v4829_v57, 0.0  ;;  %v622_v41 = vsel %vm4908_vm4, %v4829_v57, 0.0  ;;  %v624_v55 = vsel %vm4932_vm6, %v4829_v57, 0.0 }
 0x133   :  { %643 = vrot.lane.b32.xlu0 %v4836_v60, %s4734_s2  ;;  %v619_v61 = vsel %vm4832_vm1, %v4836_v60, 0.0  ;;  %v621_v33 = vsel %vm4892_vm3, %v4836_v60, 0.0  ;;  %v651_v39 = vsel %vm5535_vm0, %v620_v32, 0  ;;  %v623_v42 = vsel %vm4918_vm5, %v4836_v60, 0.0 }
 0x134   :  { %v648_v62 = vsel %vm5535_vm0, %v619_v61, 0  ;;  %v654_v40 = vsel %vm5535_vm0, %v621_v33, 0  ;;  %v4937_v45 = vand.u32 4294901760, %v651_v39  ;;  %v657_v48 = vsel %vm5535_vm0, %v622_v41, 0 }
 0x135   :  { %v4843_v63 = vand.u32 4294901760, %v648_v62  ;;  %v4944_v47 = vand.u32 4294901760, %v654_v40  ;;  %v660_v53 = vsel %vm5535_vm0, %v623_v42, 0  ;;  %v625_v56 = vsel %vm4940_vm7, %v4836_v60, 0.0 }
 0x136   :  { %vm1539_vm7 = vcmp.ge.s32.totalorder %v4865_v18, %v4814_v49  ;;  %vm1540_vm3 = vcmp.ge.s32.totalorder %v4873_v22, %v4814_v49 }
 0x137   :  { %645 = vrot.lane.b32.xlu0 %v4829_v57, %s4734_s2  ;;  %v4847_v3 = vsub.f32 %v648_v62, %v4843_v63  ;;  %v4964_v62 = vsub.f32 %v651_v39, %v4937_v45 }
 0x139   :  { %v750_v4 = vand.u32 4294901760, %v4847_v3 }
 0x13b   :  { %v751_v6 = vsub.f32 %v4847_v3, %v750_v4 }
 0x13d   :  { %v752_v7 = vand.u32 4294901760, %v751_v6  ;;  %v4966_v6 = vand.u32 4294901760, %v657_v48 }
 0x13f   :  { %3752 = vmatprep.mubr.f32.mxu1 %v752_v7  ;;  %v4969_v7 = vsub.f32 %v654_v40, %v4944_v47 }
 0x141   :  { %v770_v24 = vand.u32 4294901760, %v4969_v7 }
 0x143   :  { %v771_v41 = vsub.f32 %v4969_v7, %v770_v24 }
 0x1a5   :  { %v644_v8 = vpop.permute.xlu0 %643 }
 0x1a6   :  { %v671_v9 = vsel %vm5535_vm0, %v644_v8, 0  ;;  %v4971_v8 = vand.u32 4294901760, %v660_v53 }
 0x1a7   :  { %v676_v10 = vand.u32 4294901760, %v671_v9 }
 0x1a8   :  { %v4986_v27 = vsub.f32 %v660_v53, %v4971_v8 }
 0x1a9   :  { %v646_v11 = vpop.permute.xlu0 %645  ;;  %v4855_v13 = vsub.f32 %v671_v9, %v676_v10  ;;  %v663_v9 = vsel %vm5535_vm0, %v624_v55, 0 }
 0x1aa   :  { %v673_v12 = vsel %vm5535_vm0, %v646_v11, 0  ;;  %v666_v11 = vsel %vm5535_vm0, %v625_v56, 0  ;;  %v4982_v21 = vand.u32 4294901760, %v663_v9  ;;  %v790_v42 = vand.u32 4294901760, %v4986_v27 }
 0x1ab   :  { %v679_v14 = vand.u32 4294901760, %v673_v12  ;;  %v831_v19 = vand.u32 4294901760, %v4855_v13  ;;  %v4988_v30 = vand.u32 4294901760, %v666_v11  ;;  %v772_v56 = vand.u32 4294901760, %v771_v41 }
 0x1ac   :  { %v4997_v39 = vsub.f32 %v663_v9, %v4982_v21 }
 0x1ad   :  { %v4860_v16 = vpack.c.bf16 %v679_v14, %v676_v10  ;;  %v4862_v17 = vsub.f32 %v673_v12, %v679_v14  ;;  %v832_v61 = vsub.f32 %v4855_v13, %v831_v19  ;;  %v626_v12 = vsel %vm4957_vm8, %v4829_v57, 0.0 }
 0x1ae   :  { %v669_v32 = vsel %vm5535_vm0, %v626_v12, 0  ;;  %v5006_v44 = vsub.f32 %v666_v11, %v4988_v30  ;;  %v800_v53 = vand.u32 4294901760, %v4997_v39 }
 0x1af   :  { %v838_v20 = vand.u32 4294901760, %v4862_v17  ;;  %4241 = vmatprep.subr.bf16.mxu1 %v4860_v16  ;;  %v833_v14 = vand.u32 4294901760, %v832_v61  ;;  %v4999_v40 = vand.u32 4294901760, %v669_v32  ;;  %v791_v61 = vsub.f32 %v4986_v27, %v790_v42 }
 0x1b0   :  { %4243 = vmatpush3.bf16.xpose.msra.mxu1 %v4860_v16  ;;  %v810_v9 = vand.u32 4294901760, %v5006_v44  ;;  %v801_v11 = vsub.f32 %v4997_v39, %v800_v53 }
 0x1b1   :  { %v4875_v23 = vpack.c.bf16 %v838_v20, %v831_v19  ;;  %4245 = vmatprep.subr.bf16.mxu1 %v4860_v16  ;;  %v839_v52 = vsub.f32 %v4862_v17, %v838_v20  ;;  %v760_v19 = vand.u32 4294901760, %v4964_v62  ;;  %v4980_v20 = vsub.f32 %v657_v48, %v4966_v6 }
 0x1b2   :  { %v5013_v55 = vsub.f32 %v669_v32, %v4999_v40  ;;  %v811_v32 = vsub.f32 %v5006_v44, %v810_v9 }
 0x1b3   :  { %v840_v10 = vand.u32 4294901760, %v839_v52  ;;  %v761_v35 = vsub.f32 %v4964_v62, %v760_v19  ;;  %v780_v38 = vand.u32 4294901760, %v4980_v20 }
 0x1b4   :  { %v820_v12 = vand.u32 4294901760, %v5013_v55 }
 0x1b5   :  { %v4256_v33 = vpack.c.bf16 %v840_v10, %v833_v14  ;;  %v762_v48 = vand.u32 4294901760, %v761_v35  ;;  %v781_v52 = vsub.f32 %v4980_v20, %v780_v38  ;;  %v792_v14 = vand.u32 4294901760, %v791_v61 }
 0x1b6   :  { %v802_v35 = vand.u32 4294901760, %v801_v11  ;;  %v821_v41 = vsub.f32 %v5013_v55, %v820_v12 }
 0x1b7   :  { %v782_v10 = vand.u32 4294901760, %v781_v52 }
 0x1b8   :  { %4247 = vmatpush3.bf16.xpose.msra.mxu1 %v4860_v16  ;;  %v822_v52 = vand.u32 4294901760, %v821_v41 }
 0x1b9   :  { %4249 = vmatprep.subr.bf16.mxu1 %v4860_v16 }
 0x1c0   :  { %4251 = vmatpush3.bf16.xpose.msra.mxu1 %v4860_v16 }
 0x1c1   :  { %4253 = vmatprep.subr.bf16.mxu1 %v4860_v16 }
 0x1c8   :  { %4255 = vmatpush3.bf16.xpose.msra.mxu1 %v4860_v16 }
 0x1c9   :  { %4257 = vmatprep.subr.bf16.mxu1 %v4256_v33 }
 0x1cf   :  { %3753 = vmatmul.mubr.f32.vlgmr.msra.gmra.mrb[2].mxu1 %v762_v48  ;;  %v812_v48 = vand.u32 4294901760, %v811_v32 }
 0x1d0   :  { %3755 = vmatprep.mubr.f32.mxu1 %v772_v56  ;;  %4259 = vmatpush3.bf16.xpose.msra.mxu1 %v4256_v33  ;;  %v4272_v56 = vpack.c.bf16 %v4862_v17, %v4855_v13  ;;  %v1524_v13 = vshra.s32 %v4873_v22, 3 }
 0x1d1   :  { %4261 = vmatprep.subr.bf16.mxu1 %v4256_v33 }
 0x1d2   :  { %vm1532_vm5 = vcmp.eq.s32.totalorder %v1524_v13, %v4826_v54 }
 0x1d3   :  { %3756 = vmatmul.mubr.f32.gmra.mrb[4].mxu1 %v782_v10 }
 0x1d4   :  { %3758 = vmatprep.mubr.f32.mxu1 %v792_v14 }
 0x1d7   :  { %3759 = vmatmul.mubr.f32.gmra.mrb[6].mxu1 %v802_v35 }
 0x1d8   :  { %3761 = vmatprep.mubr.f32.mxu1 %v812_v48  ;;  %4263 = vmatpush3.bf16.xpose.msra.mxu1 %v4256_v33 }
 0x1d9   :  { %4265 = vmatprep.subr.bf16.mxu1 %v4256_v33 }
 0x1db   :  { %3762 = vmatmul.mubr.f32.gmra.mrb[8].mxu1 %v822_v52 }
 0x1dc   :  { %3780 = vmatprep.mubr.f32.mxu1 %v4843_v63 }
 0x1e0   :  { %4267 = vmatpush3.bf16.xpose.msra.mxu1 %v4256_v33 }
 0x1e1   :  { %4269 = vmatprep.subr.bf16.mxu1 %v4256_v33 }
 0x1e8   :  { %4271 = vmatpush3.bf16.xpose.msra.mxu1 %v4256_v33 }
 0x1e9   :  { %4273 = vmatprep.subr.bf16.mxu1 %v4272_v56 }
 0x1ef   :  { %3781 = vmatmul.mubr.f32.vlgmr.msra.gmra.mrb[2].mxu1 %v4937_v45 }
 0x1f0   :  { %3783 = vmatprep.mubr.f32.mxu1 %v4944_v47  ;;  %4275 = vmatpush3.bf16.xpose.msra.mxu1 %v4272_v56 }
 0x1f1   :  { %4277 = vmatprep.subr.bf16.mxu1 %v4272_v56 }
 0x1f3   :  { %3784 = vmatmul.mubr.f32.gmra.mrb[4].mxu1 %v4966_v6 }
 0x1f4   :  { %3786 = vmatprep.mubr.f32.mxu1 %v4971_v8 }
 0x1f7   :  { %3787 = vmatmul.mubr.f32.gmra.mrb[6].mxu1 %v4982_v21 }
 0x1f8   :  { %3789 = vmatprep.mubr.f32.mxu1 %v4988_v30  ;;  %4279 = vmatpush3.bf16.xpose.msra.mxu1 %v4272_v56 }
 0x1f9   :  { %4281 = vmatprep.subr.bf16.mxu1 %v4272_v56 }
 0x1fb   :  { %3790 = vmatmul.mubr.f32.gmra.mrb[8].mxu1 %v4999_v40 }
 0x1fc   :  { %3808 = vmatprep.mubr.f32.mxu1 %v4847_v3  ;;  %v1521_v3 = vshra.s32 %v4821_v51, 3  ;;  %v1526_v51 = vshra.s32 %v4889_v28, 3 }
 0x1fe   :  { %vm1529_vm11 = vcmp.eq.s32.totalorder %v1521_v3, %v4826_v54 }
 0x1ff   :  { %vm1545_vm15 = vmand %vm1529_vm11, %vm1537_vm12  ;;  %vm1534_vm11 = vcmp.eq.s32.totalorder %v1526_v51, %v4826_v54  ;;  %vm1542_vm12 = vcmp.ge.s32.totalorder %v4889_v28, %v4814_v49  ;;  %v1527_v28 = vshra.s32 %v4898_v31, 3 }
 0x200   :  { %4283 = vmatpush3.bf16.xpose.msra.mxu1 %v4272_v56 }
 0x201   :  { %4285 = vmatprep.subr.bf16.mxu1 %v4272_v56 }
 0x208   :  { %4287 = vmatpush3.bf16.xpose.msra.mxu1 %v4272_v56 }
 0x209   :  { %4289 = vmatprep.subr.bf16.mxu1 %v4860_v16 }
 0x20f   :  { %3809 = vmatmul.mubr.f32.vlgmr.msra.gmra.mrb[2].mxu1 %v4964_v62 }
 0x210   :  { %3811 = vmatprep.mubr.f32.mxu1 %v4969_v7  ;;  %4291 = vmatpush3.bf16.xpose.msra.mxu1 %v4860_v16 }
 0x211   :  { %4293 = vmatprep.subr.bf16.mxu1 %v4860_v16 }
 0x213   :  { %3812 = vmatmul.mubr.f32.gmra.mrb[4].mxu1 %v4980_v20 }
 0x214   :  { %3814 = vmatprep.mubr.f32.mxu1 %v4986_v27 }
 0x217   :  { %3815 = vmatmul.mubr.f32.gmra.mrb[6].mxu1 %v4997_v39 }
 0x218   :  { %3817 = vmatprep.mubr.f32.mxu1 %v5006_v44  ;;  %4295 = vmatpush3.bf16.xpose.msra.mxu1 %v4860_v16 }
 0x219   :  { %4297 = vmatprep.subr.bf16.mxu1 %v4860_v16 }
 0x21b   :  { %3818 = vmatmul.mubr.f32.gmra.mrb[8].mxu1 %v5013_v55 }
 0x21c   :  { %3836 = vmatprep.mubr.f32.mxu1 %v750_v4  ;;  %v1523_v4 = vshra.s32 %v4865_v18, 3  ;;  %v1525_v18 = vshra.s32 %v4880_v25, 3 }
 0x21e   :  { %vm1531_vm0 = vcmp.eq.s32.totalorder %v1523_v4, %v4826_v54 }
 0x220   :  { %4299 = vmatpush3.bf16.xpose.msra.mxu1 %v4860_v16 }
 0x221   :  { %4301 = vmatprep.subr.bf16.mxu1 %v4860_v16 }
 0x228   :  { %4303 = vmatpush3.bf16.xpose.msra.mxu1 %v4860_v16 }
 0x229   :  { %4305 = vmatprep.subr.bf16.mxu1 %v4875_v23 }
 0x22f   :  { %3837 = vmatmul.mubr.f32.vlgmr.msra.gmra.mrb[2].mxu1 %v760_v19 }
 0x230   :  { %3839 = vmatprep.mubr.f32.mxu1 %v770_v24  ;;  %4307 = vmatpush3.bf16.xpose.msra.mxu1 %v4875_v23 }
 0x231   :  { %4309 = vmatprep.subr.bf16.mxu1 %v4875_v23 }
 0x233   :  { %3840 = vmatmul.mubr.f32.gmra.mrb[4].mxu1 %v780_v38 }
 0x234   :  { %3842 = vmatprep.mubr.f32.mxu1 %v790_v42 }
 0x237   :  { %3843 = vmatmul.mubr.f32.gmra.mrb[6].mxu1 %v800_v53  ;;  %v1528_v53 = vshra.s32 %v4914_v36, 3 }
 0x238   :  { %3845 = vmatprep.mubr.f32.mxu1 %v810_v9  ;;  %4311 = vmatpush3.bf16.xpose.msra.mxu1 %v4875_v23 }
 0x239   :  { %4313 = vmatprep.subr.bf16.mxu1 %v4875_v23 }
 0x23b   :  { %3846 = vmatmul.mubr.f32.gmra.mrb[8].mxu1 %v820_v12 }
 0x23c   :  { %3864 = vmatprep.mubr.f32.mxu1 %v4843_v63 }
 0x240   :  { %4315 = vmatpush3.bf16.xpose.msra.mxu1 %v4875_v23 }
 0x241   :  { %4317 = vmatprep.subr.bf16.mxu1 %v4875_v23 }
 0x248   :  { %4319 = vmatpush3.bf16.xpose.msra.mxu1 %v4875_v23 }
 0x249   :  { %4321 = vmatprep.subr.bf16.mxu1 %v4860_v16 }
 0x24f   :  { %3865 = vmatmul.mubr.f32.vlgmr.msra.gmra.mrb[2].mxu1 %v4937_v45 }
 0x250   :  { %3867 = vmatprep.mubr.f32.mxu1 %v4944_v47  ;;  %4323 = vmatpush3.bf16.xpose.msra.mxu1 %v4860_v16 }
 0x251   :  { %4325 = vmatprep.subr.bf16.mxu1 %v4860_v16 }
 0x253   :  { %3868 = vmatmul.mubr.f32.gmra.mrb[4].mxu1 %v4966_v6 }
 0x254   :  { %3870 = vmatprep.mubr.f32.mxu1 %v4971_v8 }
 0x257   :  { %3871 = vmatmul.mubr.f32.gmra.mrb[6].mxu1 %v4982_v21 }
 0x258   :  { %3873 = vmatprep.mubr.f32.mxu1 %v4988_v30  ;;  %4327 = vmatpush3.bf16.xpose.msra.mxu1 %v4860_v16 }
 0x259   :  { %4329 = vmatprep.subr.bf16.mxu1 %v4860_v16 }
 0x25b   :  { %3874 = vmatmul.mubr.f32.gmra.mrb[8].mxu1 %v4999_v40 }
 0x25c   :  { %3892 = vmatprep.mubr.f32.mxu1 %v4843_v63  ;;  %v1522_v63 = vshra.s32 %v4858_v15, 3 }
 0x25e   :  { %vm1530_vm9 = vcmp.eq.s32.totalorder %v1522_v63, %v4826_v54 }
 0x25f   :  { %vm1546_vm13 = vmand %vm1530_vm9, %vm1538_vm10 }
 0x260   :  { %4331 = vmatpush3.bf16.xpose.msra.mxu1 %v4860_v16  ;;  %vm1547_vm9 = vmand %vm1531_vm0, %vm1539_vm7 }
 0x261   :  { %4333 = vmatprep.subr.bf16.mxu1 %v4860_v16  ;;  %vm1548_vm10 = vmand %vm1532_vm5, %vm1540_vm3  ;;  %vm1533_vm3 = vcmp.eq.s32.totalorder %v1525_v18, %v4826_v54  ;;  %vm1541_vm5 = vcmp.ge.s32.totalorder %v4880_v25, %v4814_v49 }
 0x262   :  { %vm1550_vm0 = vmand %vm1534_vm11, %vm1542_vm12  ;;  %vm1544_vm11 = vcmp.ge.s32.totalorder %v4914_v36, %v4814_v49 }
 0x263   :  { %vm1549_vm7 = vmand %vm1533_vm3, %vm1541_vm5 }
 0x268   :  { %4335 = vmatpush3.bf16.xpose.msra.mxu1 %v4860_v16 }
 0x26f   :  { %3893 = vmatmul.mubr.f32.vlgmr.msra.gmra.mrb[2].mxu1 %v4937_v45 }
 0x270   :  { %3895 = vmatprep.mubr.f32.mxu1 %v4944_v47 }
 0x273   :  { %3896 = vmatmul.mubr.f32.gmra.mrb[4].mxu1 %v4966_v6 }
 0x274   :  { %3898 = vmatprep.mubr.f32.mxu1 %v4971_v8 }
 0x277   :  { %3899 = vmatmul.mubr.f32.gmra.mrb[6].mxu1 %v4982_v21 }
 0x278   :  { %3901 = vmatprep.mubr.f32.mxu1 %v4988_v30 }
 0x27b   :  { %3902 = vmatmul.mubr.f32.gmra.mrb[8].mxu1 %v4999_v40 }
 0x342   :  { %v3894_v16 = vpop.f32.mrb[2].mxu1 }
 0x343   :  { %v1514_v17 = vmul.f32 0.35355338, %v3894_v16  ;;  %v1467_v23 = vpop.f32.mrb[3].mxu1 }
 0x344   :  { %v1513_v45 = vmul.f32 0.35355338, %v1467_v23 }
 0x345   :  { %v1554_v15 = vsel %vm1546_vm13, %v1514_v17, -1e+30  ;;  %vm1535_vm13 = vcmp.eq.s32.totalorder %v1527_v28, %v4826_v54 }
 0x346   :  { %v3897_v47 = vpop.f32.mrb[4].mxu1  ;;  %v1565_v62 = vsel %vm1561_vm14, %v1554_v15, -inf  ;;  %v1553_v8 = vsel %vm1545_vm15, %v1513_v45, -1e+30  ;;  %vm1543_vm15 = vcmp.ge.s32.totalorder %v4898_v31, %v4814_v49 }
 0x347   :  { %v1516_v6 = vmul.f32 0.35355338, %v3897_v47  ;;  %1566 = vmax.xlane.f32.xlu1 %v1565_v62  ;;  %v1479_v7 = vpop.f32.mrb[5].mxu1  ;;  %v1562_v20 = vsel %vm1561_vm14, %v1553_v8, -inf }
 0x348   :  { %v1515_v19 = vmul.f32 0.35355338, %v1479_v7 }
 0x349   :  { %v1556_v33 = vsel %vm1548_vm10, %v1516_v6, -1e+30  ;;  %vm1536_vm10 = vcmp.eq.s32.totalorder %v1528_v53, %v4826_v54 }
 0x34a   :  { %v3900_v22 = vpop.f32.mrb[6].mxu1  ;;  %v1555_v21 = vsel %vm1547_vm9, %v1515_v19, -1e+30  ;;  %v1571_v39 = vsel %vm1561_vm14, %v1556_v33, -inf  ;;  %vm1551_vm9 = vmand %vm1535_vm13, %vm1543_vm15 }
 0x34b   :  { %v1518_v24 = vmul.f32 0.35355338, %v3900_v22  ;;  %1563 = vmax.xlane.f32.xlu1 %v1562_v20  ;;  %v1491_v27 = vpop.f32.mrb[7].mxu1  ;;  %v1568_v30 = vsel %vm1561_vm14, %v1555_v21, -inf  ;;  %vm1552_vm12 = vmand %vm1536_vm10, %vm1544_vm11 }
 0x34c   :  { %1569 = vmax.xlane.f32.xlu0 %v1568_v30  ;;  %v1517_v40 = vmul.f32 0.35355338, %v1491_v27 }
 0x34d   :  { %v1558_v44 = vsel %vm1550_vm0, %v1518_v24, -1e+30 }
 0x34e   :  { %v3903_v38 = vpop.f32.mrb[8].mxu1  ;;  %v1577_v55 = vsel %vm1561_vm14, %v1558_v44, -inf  ;;  %v1557_v61 = vsel %vm1549_vm7, %v1517_v40, -1e+30 }
 0x34f   :  { %1572 = vmax.xlane.f32.xlu1 %v1571_v39  ;;  %v1503_v42 = vpop.f32.mrb[9].mxu1  ;;  %v1574_v9 = vsel %vm1561_vm14, %v1557_v61, -inf  ;;  %v1520_v10 = vmul.f32 0.35355338, %v3903_v38 }
 0x350   :  { %v1519_v25 = vmul.f32 0.35355338, %v1503_v42 }
 0x351   :  { %v1560_v12 = vsel %vm1552_vm12, %v1520_v10, -1e+30 }
 0x352   :  { %v1559_v11 = vsel %vm1551_vm9, %v1519_v25, -1e+30  ;;  %v1583_v14 = vsel %vm1561_vm14, %v1560_v12, -inf }
 0x353   :  { %1578 = vmax.xlane.f32.xlu1 %v1577_v55  ;;  %v1580_v31 = vsel %vm1561_vm14, %v1559_v11, -inf }
 0x357   :  { %1575 = vmax.xlane.f32.xlu1 %v1574_v9 }
 0x35b   :  { %1581 = vmax.xlane.f32.xlu1 %v1580_v31 }
 0x35f   :  { %1584 = vmax.xlane.f32.xlu1 %v1583_v14 }
 0x362   :  { %631 = vrot.lane.b32.xlu0 %v4829_v57, %s4735_s11 }
 0x370   :  { %629 = vrot.lane.b32.xlu1 %v4836_v60, %s4735_s11 }
 0x3d4   :  { %v1567_v54 = vpop.xlane.xlu1 %1566 }
 0x3d5   :  { %v1587_v49 = vsub.f32 %v1554_v15, %v1567_v54 }
 0x3d7   :  { %v1596_v36 = vmul.f32 1.442695, %v1587_v49 }
 0x3d8   :  { %v1564_v32 = vpop.xlane.xlu1 %1563 }
 0x3d9   :  { %4626 = vpow2.f32 %v1596_v36  ;;  %v1586_v35 = vsub.f32 %v1553_v8, %v1564_v32  ;;  %v1570_v41 = vpop.xlane.xlu0 %1569 }
 0x3da   :  { %v1588_v48 = vsub.f32 %v1555_v21, %v1570_v41 }
 0x3db   :  { %v1594_v52 = vmul.f32 1.442695, %v1586_v35 }
 0x3dc   :  { %v1598_v56 = vmul.f32 1.442695, %v1588_v48  ;;  %v1573_v63 = vpop.xlane.xlu1 %1572 }
 0x3dd   :  { %4628 = vpow2.f32 %v1594_v52  ;;  %v1589_v3 = vsub.f32 %v1556_v33, %v1573_v63  ;;  %v632_v4 = vpop.permute.xlu0 %631 }
 0x3de   :  { %4630 = vpow2.f32 %v1598_v56  ;;  %v636_v57 = vsel %vm4883_vm2, %v632_v4, 0.0  ;;  %v638_v47 = vsel %vm4908_vm4, %v632_v4, 0.0  ;;  %v5153_v26 = vsel %vm4932_vm6, %v632_v4, 0.0 }
 0x3df   :  { %v1600_v13 = vmul.f32 1.442695, %v1589_v3  ;;  %v1678_v45 = vand.u32 4294901760, %v636_v57  ;;  %v5157_v8 = vsel %vm4957_vm8, %v632_v4, 0.0  ;;  %v1684_v19 = vand.u32 4294901760, %v638_v47 }
 0x3e0   :  { %v1579_v16 = vpop.xlane.xlu1 %1578  ;;  %v1690_v24 = vand.u32 4294901760, %v5153_v26  ;;  %v1696_v58 = vand.u32 4294901760, %v5157_v8  ;;  %vm5555_vm2 = vnez %v5544_v29  ;;  %vm5556_vm4 = vnez %v5548_v37 }
 0x3e1   :  { %4632 = vpow2.f32 %v1600_v13  ;;  %v1591_v60 = vsub.f32 %v1558_v44, %v1579_v16  ;;  %v5159_v18 = vsub.f32 %v636_v57, %v1678_v45  ;;  %v1850_v30 = vsub.f32 %v638_v47, %v1684_v19 }
 0x3e2   :  { %v1864_v44 = vsub.f32 %v5153_v26, %v1690_v24  ;;  %v5180_v55 = vsub.f32 %v5157_v8, %v1696_v58  ;;  %vm5557_vm6 = vnez %v5552_v46 }
 0x3e3   :  { %v5143_v17 = vpop.eup %4626  ;;  %v1604_v23 = vmul.f32 1.442695, %v1591_v60  ;;  %v1837_v39 = vand.u32 4294901760, %v5159_v18  ;;  %v1851_v10 = vand.u32 4294901760, %v1850_v30 }
 0x3e4   :  { %v1576_v15 = vpop.xlane.xlu1 %1575  ;;  %v1613_v51 = vsel %vm1561_vm14, %v5143_v17, 0.0  ;;  %v1865_v48 = vand.u32 4294901760, %v1864_v44  ;;  %v1879_v29 = vand.u32 4294901760, %v5180_v55 }
 0x3e5   :  { %4634 = vpow2.f32 %v1604_v23  ;;  %v1590_v62 = vsub.f32 %v1557_v61, %v1576_v15  ;;  %1614 = vadd.xlane.f32.xlu1 %v1613_v51  ;;  %v1838_v9 = vsub.f32 %v5159_v18, %v1837_v39  ;;  %v1852_v63 = vsub.f32 %v1850_v30, %v1851_v10 }
 0x3e7   :  { %v5149_v6 = vpop.eup %4628  ;;  %v1602_v7 = vmul.f32 1.442695, %v1590_v62  ;;  %v1839_v13 = vand.u32 4294901760, %v1838_v9 }
 0x3e8   :  { %v1582_v22 = vpop.xlane.xlu1 %1581  ;;  %v1610_v34 = vsel %vm1561_vm14, %v5149_v6, 0.0  ;;  %v5163_v20 = vpop.eup %4630 }
 0x3e9   :  { %4636 = vpow2.f32 %v1602_v7  ;;  %v1592_v21 = vsub.f32 %v1559_v11, %v1582_v22  ;;  %1611 = vadd.xlane.f32.xlu1 %v1610_v34  ;;  %v1616_v38 = vsel %vm1561_vm14, %v5163_v20, 0.0 }
 0x3eb   :  { %v5165_v43 = vpop.eup %4632  ;;  %v1606_v27 = vmul.f32 1.442695, %v1592_v21 }
 0x3ec   :  { %v1585_v33 = vpop.xlane.xlu1 %1584  ;;  %v1619_v28 = vsel %vm1561_vm14, %v5165_v43, 0.0 }
 0x3ed   :  { %4638 = vpow2.f32 %v1606_v27  ;;  %v1593_v40 = vsub.f32 %v1560_v12, %v1585_v33  ;;  %1620 = vadd.xlane.f32.xlu0 %v1619_v28  ;;  %1617 = vadd.xlane.f32.xlu1 %v1616_v38 }
 0x3ef   :  { %v5174_v42 = vpop.eup %4634  ;;  %v1608_v53 = vmul.f32 1.442695, %v1593_v40  ;;  %v1866_v40 = vsub.f32 %v1864_v44, %v1865_v48 }
 0x3f0   :  { %v630_v25 = vpop.permute.xlu1 %629  ;;  %v1625_v61 = vsel %vm1561_vm14, %v5174_v42, 0.0 }
 0x3f1   :  { %4640 = vpow2.f32 %v1608_v53  ;;  %v635_v11 = vsel %vm4832_vm1, %v630_v25, 0.0  ;;  %v637_v31 = vsel %vm5555_vm2, %v630_v25, 0.0  ;;  %v639_v12 = vsel %vm5556_vm4, %v630_v25, 0.0  ;;  %1626 = vadd.xlane.f32.xlu0 %v1625_v61 }
 0x3f2   :  { %v641_v14 = vsel %vm5557_vm6, %v630_v25, 0.0  ;;  %v1675_v54 = vand.u32 4294901760, %v635_v11  ;;  %v1681_v49 = vand.u32 4294901760, %v637_v31  ;;  %v1687_v36 = vand.u32 4294901760, %v639_v12 }
 0x3f3   :  { %v5193_v32 = vpop.eup %4636  ;;  %v1693_v35 = vand.u32 4294901760, %v641_v14  ;;  %vm5558_vm1 = vcmask 261120  }
 0x3f4   :  { %v5195_v41 = vpack.c.bf16 %v1678_v45, %v1675_v54  ;;  %v1829_v59 = vsub.f32 %v635_v11, %v1675_v54  ;;  %v1843_v52 = vsub.f32 %v637_v31, %v1681_v49  ;;  %v1857_v56 = vsub.f32 %v639_v12, %v1687_v36  ;;  %vm5559_vm8 = vmmov %vm5558_vm1 }
 0x3f5   :  { %v1871_v37 = vsub.f32 %v641_v14, %v1693_v35  ;;  %v5198_v3 = vpack.c.bf16 %v1684_v19, %v1681_v49  ;;  %v1622_v46 = vsel %vm1561_vm14, %v5193_v32, 0.0  ;;  %v5216_v26 = vpack.c.bf16 %v1690_v24, %v1687_v36  ;;  %vm5561_vm0 = vmmov %vm5558_vm1 }
 0x3f6   :  { %4337 = vmatprep.subr.bf16.mxu1 %v5195_v41  ;;  %v1830_v4 = vand.u32 4294901760, %v1829_v59  ;;  %1623 = vadd.xlane.f32.xlu1 %v1622_v46  ;;  %v1844_v57 = vand.u32 4294901760, %v1843_v52  ;;  %v1858_v60 = vand.u32 4294901760, %v1857_v56  ;;  %v5206_v45 = vpack.c.bf16 %v1850_v30, %v1843_v52  ;;  %vm5562_vm3 = vmmov %vm5561_vm0 }
 0x3f7   :  { %v5203_v16 = vpop.eup %4638  ;;  %4339 = vmatpush3.bf16.msra.mxu1 %v5195_v41  ;;  %v1872_v23 = vand.u32 4294901760, %v1871_v37  ;;  %v5211_v47 = vpack.c.bf16 %v1864_v44, %v1857_v56  ;;  %v5214_v62 = vpack.c.bf16 %v5180_v55, %v1871_v37  ;;  %v5234_v53 = vpack.c.bf16 %v1696_v58, %v1693_v35  ;;  %vm5563_vm5 = vmmov %vm5561_vm0 }
 0x3f8   :  { %4341 = vmatprep.subr.bf16.mxu1 %v5198_v3  ;;  %v1628_v15 = vsel %vm1561_vm14, %v5203_v16, 0.0  ;;  %v1831_v51 = vsub.f32 %v1829_v59, %v1830_v4  ;;  %v1845_v7 = vsub.f32 %v1843_v52, %v1844_v57  ;;  %v1859_v19 = vsub.f32 %v1857_v56, %v1858_v60  ;;  %vm5564_vm7 = vmmov %vm5561_vm0 }
 0x3f9   :  { %v5218_v22 = vpack.c.bf16 %v1837_v39, %v1830_v4  ;;  %v5220_v21 = vpack.c.bf16 %v1851_v10, %v1844_v57  ;;  %v5222_v27 = vpack.c.bf16 %v1865_v48, %v1858_v60  ;;  %v5224_v30 = vpack.c.bf16 %v1879_v29, %v1872_v23  ;;  %vm5565_vm13 = vmmov %vm5561_vm0 }
 0x3fa   :  { %v1832_v34 = vand.u32 4294901760, %v1831_v51  ;;  %1629 = vadd.xlane.f32.xlu1 %v1628_v15  ;;  %v1846_v28 = vand.u32 4294901760, %v1845_v7  ;;  %v1853_v39 = vand.u32 4294901760, %v1852_v63  ;;  %v1860_v61 = vand.u32 4294901760, %v1859_v19  ;;  %vm5566_vm15 = vmmov %vm5561_vm0 }
 0x3fb   :  { %v5226_v33 = vpop.eup %4640  ;;  %4343 = vmatpush3.bf16.msra.mxu1 %v5198_v3  ;;  %v1873_v9 = vsub.f32 %v1871_v37, %v1872_v23  ;;  %v1867_v10 = vand.u32 4294901760, %v1866_v40  ;;  %v1880_v11 = vsub.f32 %v5180_v55, %v1879_v29  ;;  %v4368_v12 = vpack.c.bf16 %v5159_v18, %v1829_v59  ;;  %vm5567_vm9 = vmmov %vm5561_vm0 }
 0x3fc   :  { %4345 = vmatprep.subr.bf16.mxu1 %v5216_v26  ;;  %v1631_v24 = vsel %vm1561_vm14, %v5226_v33, 0.0  ;;  %v4352_v38 = vpack.c.bf16 %v1839_v13, %v1832_v34  ;;  %v4356_v25 = vpack.c.bf16 %v1853_v39, %v1846_v28 }
 0x3fd   :  { %1632 = vadd.xlane.f32.xlu0 %v1631_v24  ;;  %v4360_v31 = vpack.c.bf16 %v1867_v10, %v1860_v61  ;;  %v1874_v44 = vand.u32 4294901760, %v1873_v9  ;;  %v1881_v8 = vand.u32 4294901760, %v1880_v11 }
 0x3fe   :  { %4353 = vmatprep.subr.bf16.mxu0 %v4352_v38 }
 0x3ff   :  { %4347 = vmatpush3.bf16.msra.mxu1 %v5216_v26  ;;  %4355 = vmatpush3.bf16.msra.mxu0 %v4352_v38  ;;  %v4364_v58 = vpack.c.bf16 %v1881_v8, %v1874_v44 }
 0x400   :  { %4349 = vmatprep.subr.bf16.mxu1 %v5234_v53  ;;  %4357 = vmatprep.subr.bf16.mxu0 %v4356_v25 }
 0x403   :  { %4351 = vmatpush3.bf16.msra.mxu1 %v5234_v53  ;;  %4359 = vmatpush3.bf16.msra.mxu0 %v4356_v25 }
 0x404   :  { %4361 = vmatprep.subr.bf16.mxu0 %v4360_v31 }
 0x407   :  { %4363 = vmatpush3.bf16.msra.mxu0 %v4360_v31 }
 0x408   :  { %4365 = vmatprep.subr.bf16.mxu0 %v4364_v58 }
 0x40b   :  { %4367 = vmatpush3.bf16.msra.mxu0 %v4364_v58  ;;  %2516 = vrot.lane.b32.xlu1 %v4788_v0, %s4736_s12 }
 0x40c   :  { %4369 = vmatprep.subr.bf16.mxu0 %v4368_v12 }
 0x40f   :  { %2520 = vrot.lane.b32.xlu1 %v4792_v2, %s4736_s12 }
 0x413   :  { %2518 = vrot.lane.b32.xlu0 %v4790_v1, %s4736_s12  ;;  %2522 = vrot.lane.b32.xlu1 %v4796_v5, %s4736_s12 }
 0x417   :  { %3344 = vrot.lane.b32.xlu0 %v4819_v50, %s4736_s12 }
 0x472   :  { %v1615_v55 = vpop.xlane.xlu1 %1614 }
 0x473   :  { %4642 = vrcp.f32 %v1615_v55 }
 0x476   :  { %v1612_v14 = vpop.xlane.xlu1 %1611 }
 0x477   :  { %4644 = vrcp.f32 %v1612_v14 }
 0x47a   :  { %v1621_v54 = vpop.xlane.xlu0 %1620  ;;  %v1618_v49 = vpop.xlane.xlu1 %1617 }
 0x47b   :  { %4646 = vrcp.f32 %v1621_v54 }
 0x47c   :  { %4648 = vrcp.f32 %v1618_v49 }
 0x47d   :  { %v4643_v18 = vpop.eup %4642 }
 0x47e   :  { %v1627_v36 = vpop.xlane.xlu0 %1626  ;;  %v1637_v0 = vmul.f32 %v4643_v18, %v5143_v17 }
 0x47f   :  { %4650 = vrcp.f32 %v1627_v36 }
 0x480   :  { %v1654_v1 = vsel %vm1561_vm14, %v1637_v0, 0 }
 0x481   :  { %v4645_v2 = vpop.eup %4644  ;;  %v5248_v35 = vand.u32 4294901760, %v1654_v1 }
 0x482   :  { %v1635_v5 = vmul.f32 %v4645_v2, %v5149_v6 }
 0x483   :  { %v5252_v50 = vsub.f32 %v1654_v1, %v5248_v35  ;;  %v1624_v59 = vpop.xlane.xlu1 %1623 }
 0x484   :  { %v1651_v48 = vsel %vm1561_vm14, %v1635_v5, 0  ;;  %4652 = vrcp.f32 %v1624_v59 }
 0x485   :  { %v4647_v29 = vpop.eup %4646  ;;  %v5255_v52 = vand.u32 4294901760, %v1651_v48  ;;  %v1759_v17 = vand.u32 4294901760, %v5252_v50 }
 0x486   :  { %v4649_v56 = vpop.eup %4648  ;;  %v1641_v37 = vmul.f32 %v4647_v29, %v5165_v43 }
 0x487   :  { %3948 = vmatprep.mubr.f32.mxu0 %v5255_v52  ;;  %v1639_v63 = vmul.f32 %v4649_v56, %v5163_v20  ;;  %v5262_v6 = vsub.f32 %v1651_v48, %v5255_v52  ;;  %v1630_v46 = vpop.xlane.xlu1 %1629  ;;  %v1760_v15 = vsub.f32 %v5252_v50, %v1759_v17 }
 0x488   :  { %3949 = vmatmul.mubr.f32.vlgmr.msra.gmra.mrb[2].mxu0 %v5248_v35  ;;  %v1660_v4 = vsel %vm1561_vm14, %v1641_v37, 0  ;;  %4654 = vrcp.f32 %v1630_v46 }
 0x489   :  { %v4651_v13 = vpop.eup %4650  ;;  %4371 = vmatpush3.bf16.msra.mxu0 %v4368_v12  ;;  %v1657_v57 = vsel %vm1561_vm14, %v1639_v63, 0  ;;  %v5267_v60 = vand.u32 4294901760, %v1660_v4  ;;  %v1749_v43 = vand.u32 4294901760, %v5262_v6  ;;  %v1761_v39 = vand.u32 4294901760, %v1760_v15 }
 0x48a   :  { %4373 = vmatprep.subr.bf16.mxu0 %v5206_v45  ;;  %v1633_v20 = vpop.xlane.xlu0 %1632  ;;  %v5271_v23 = vand.u32 4294901760, %v1657_v57  ;;  %v1645_v51 = vmul.f32 %v4651_v13, %v5174_v42 }
 0x48b   :  { %4656 = vrcp.f32 %v1633_v20  ;;  %v1750_v7 = vsub.f32 %v5262_v6, %v1749_v43  ;;  %v5281_v19 = vsub.f32 %v1660_v4, %v5267_v60 }
 0x48c   :  { %3951 = vmatprep.mubr.f32.mxu0 %v5271_v23  ;;  %v5285_v34 = vsub.f32 %v1657_v57, %v5271_v23  ;;  %v1666_v28 = vsel %vm1561_vm14, %v1645_v51, 0 }
 0x48d   :  { %3952 = vmatmul.mubr.f32.gmra.mrb[4].mxu0 %v5267_v60  ;;  %v1751_v24 = vand.u32 4294901760, %v1750_v7  ;;  %v1779_v42 = vand.u32 4294901760, %v5281_v19  ;;  %v5290_v38 = vand.u32 4294901760, %v1666_v28 }
 0x48e   :  { %4375 = vmatpush3.bf16.msra.mxu0 %v5206_v45  ;;  %v1769_v40 = vand.u32 4294901760, %v5285_v34  ;;  %v4653_v25 = vpop.eup %4652 }
 0x48f   :  { %4377 = vmatprep.subr.bf16.mxu0 %v5211_v47  ;;  %3920 = vmatprep.mubr.f32.mxu1 %v1751_v24  ;;  %v1780_v61 = vsub.f32 %v5281_v19, %v1779_v42  ;;  %v1643_v10 = vmul.f32 %v4653_v25, %v5193_v32  ;;  %v5303_v45 = vsub.f32 %v1666_v28, %v5290_v38 }
 0x490   :  { %3921 = vmatmul.mubr.f32.vlgmr.msra.gmra.mrb[10].mxu1 %v1761_v39  ;;  %v1770_v9 = vsub.f32 %v5285_v34, %v1769_v40 }
 0x491   :  { %v1781_v11 = vand.u32 4294901760, %v1780_v61  ;;  %v1663_v44 = vsel %vm1561_vm14, %v1643_v10, 0  ;;  %v1799_v55 = vand.u32 4294901760, %v5303_v45 }
 0x492   :  { %4379 = vmatpush3.bf16.msra.mxu0 %v5211_v47  ;;  %v1771_v31 = vand.u32 4294901760, %v1770_v9  ;;  %v4655_v8 = vpop.eup %4654  ;;  %v5308_v58 = vand.u32 4294901760, %v1663_v44 }
 0x493   :  { %4381 = vmatprep.subr.bf16.mxu0 %v5214_v62  ;;  %v1647_v12 = vmul.f32 %v4655_v8, %v5203_v16  ;;  %v1800_v36 = vsub.f32 %v5303_v45, %v1799_v55 }
 0x494   :  { %3923 = vmatprep.mubr.f32.mxu1 %v1771_v31  ;;  %3954 = vmatprep.mubr.f32.mxu0 %v5308_v58  ;;  %v1788_v14 = vsub.f32 %v1663_v44, %v5308_v58 }
 0x495   :  { %v4657_v32 = vpop.eup %4656  ;;  %3924 = vmatmul.mubr.f32.gmra.mrb[12].mxu1 %v1781_v11  ;;  %3955 = vmatmul.mubr.f32.gmra.mrb[6].mxu0 %v5290_v38  ;;  %v1669_v47 = vsel %vm1561_vm14, %v1647_v12, 0  ;;  %v1801_v59 = vand.u32 4294901760, %v1800_v36 }
 0x496   :  { %v1649_v54 = vmul.f32 %v4657_v32, %v5226_v33  ;;  %4383 = vmatpush3.bf16.msra.mxu0 %v5214_v62  ;;  %v5318_v49 = vand.u32 4294901760, %v1669_v47  ;;  %v1789_v18 = vand.u32 4294901760, %v1788_v14 }
 0x497   :  { %4385 = vmatprep.subr.bf16.mxu0 %v5195_v41 }
 0x498   :  { %v1672_v16 = vsel %vm1561_vm14, %v1649_v54, 0  ;;  %3957 = vmatprep.mubr.f32.mxu0 %v5318_v49  ;;  %v1790_v0 = vsub.f32 %v1788_v14, %v1789_v18  ;;  %v1808_v2 = vsub.f32 %v1669_v47, %v5318_v49  ;;  %vm5560_vm14 = vmmov %vm5558_vm1 }
 0x499   :  { %v5324_v1 = vand.u32 4294901760, %v1672_v16 }
 0x49a   :  { %v1791_v5 = vand.u32 4294901760, %v1790_v0  ;;  %v1809_v62 = vand.u32 4294901760, %v1808_v2 }
 0x49b   :  { %3958 = vmatmul.mubr.f32.gmra.mrb[8].mxu0 %v5324_v1  ;;  %v1818_v33 = vsub.f32 %v1672_v16, %v5324_v1 }
 0x49c   :  { %3976 = vmatprep.mubr.f32.mxu0 %v5262_v6  ;;  %3926 = vmatprep.mubr.f32.mxu1 %v1791_v5  ;;  %v1810_v48 = vsub.f32 %v1808_v2, %v1809_v62 }
 0x49d   :  { %v1819_v29 = vand.u32 4294901760, %v1818_v33  ;;  %3927 = vmatmul.mubr.f32.gmra.mrb[14].mxu1 %v1801_v59 }
 0x49e   :  { %v1811_v56 = vand.u32 4294901760, %v1810_v48 }
 0x49f   :  { %3977 = vmatmul.mubr.f32.vlgmr.msra.gmra.mrb[2].mxu0 %v5252_v50  ;;  %v1820_v37 = vsub.f32 %v1818_v33, %v1819_v29 }
 0x4a0   :  { %4387 = vmatpush3.bf16.msra.mxu0 %v5195_v41  ;;  %3979 = vmatprep.mubr.f32.mxu0 %v5285_v34 }
 0x4a1   :  { %3929 = vmatprep.mubr.f32.mxu1 %v1811_v56  ;;  %4389 = vmatprep.subr.bf16.mxu0 %v5198_v3  ;;  %v1821_v63 = vand.u32 4294901760, %v1820_v37 }
 0x4a3   :  { %3930 = vmatmul.mubr.f32.gmra.mrb[16].mxu1 %v1821_v63  ;;  %3980 = vmatmul.mubr.f32.gmra.mrb[4].mxu0 %v5281_v19 }
 0x4a4   :  { %4391 = vmatpush3.bf16.msra.mxu0 %v5198_v3  ;;  %3982 = vmatprep.mubr.f32.mxu0 %v1788_v14 }
 0x4a5   :  { %4393 = vmatprep.subr.bf16.mxu0 %v5216_v26 }
 0x4a7   :  { %3983 = vmatmul.mubr.f32.gmra.mrb[6].mxu0 %v5303_v45 }
 0x4a8   :  { %4395 = vmatpush3.bf16.msra.mxu0 %v5216_v26  ;;  %3985 = vmatprep.mubr.f32.mxu0 %v1808_v2 }
 0x4a9   :  { %4397 = vmatprep.subr.bf16.mxu0 %v5234_v53 }
 0x4ab   :  { %3986 = vmatmul.mubr.f32.gmra.mrb[8].mxu0 %v1818_v33 }
 0x4ac   :  { %4399 = vmatpush3.bf16.msra.mxu0 %v5234_v53  ;;  %4004 = vmatprep.mubr.f32.mxu0 %v1749_v43 }
 0x4ad   :  { %4401 = vmatprep.subr.bf16.mxu0 %v5218_v22 }
 0x4af   :  { %4005 = vmatmul.mubr.f32.vlgmr.msra.gmra.mrb[2].mxu0 %v1759_v17 }
 0x4b0   :  { %4403 = vmatpush3.bf16.msra.mxu0 %v5218_v22  ;;  %4007 = vmatprep.mubr.f32.mxu0 %v1769_v40 }
 0x4b1   :  { %4405 = vmatprep.subr.bf16.mxu0 %v5220_v21 }
 0x4b3   :  { %4008 = vmatmul.mubr.f32.gmra.mrb[4].mxu0 %v1779_v42 }
 0x4b4   :  { %4407 = vmatpush3.bf16.msra.mxu0 %v5220_v21  ;;  %4010 = vmatprep.mubr.f32.mxu0 %v1789_v18 }
 0x4b5   :  { %4409 = vmatprep.subr.bf16.mxu0 %v5222_v27 }
 0x4b7   :  { %4011 = vmatmul.mubr.f32.gmra.mrb[6].mxu0 %v1799_v55 }
 0x4b8   :  { %4411 = vmatpush3.bf16.msra.mxu0 %v5222_v27  ;;  %4013 = vmatprep.mubr.f32.mxu0 %v1809_v62 }
 0x4b9   :  { %4413 = vmatprep.subr.bf16.mxu0 %v5224_v30 }
 0x4bb   :  { %4014 = vmatmul.mubr.f32.gmra.mrb[8].mxu0 %v1819_v29 }
 0x4bc   :  { %4415 = vmatpush3.bf16.msra.mxu0 %v5224_v30  ;;  %4032 = vmatprep.mubr.f32.mxu0 %v5255_v52 }
 0x4bd   :  { %4417 = vmatprep.subr.bf16.mxu0 %v5195_v41 }
 0x4bf   :  { %4033 = vmatmul.mubr.f32.vlgmr.msra.gmra.mrb[2].mxu0 %v5248_v35 }
 0x4c0   :  { %4419 = vmatpush3.bf16.msra.mxu0 %v5195_v41  ;;  %4035 = vmatprep.mubr.f32.mxu0 %v5271_v23  ;;  %v2517_v41 = vpop.permute.xlu1 %2516 }
 0x4c1   :  { %4421 = vmatprep.subr.bf16.mxu0 %v5198_v3 }
 0x4c3   :  { %4036 = vmatmul.mubr.f32.gmra.mrb[4].mxu0 %v5267_v60 }
 0x4c4   :  { %4423 = vmatpush3.bf16.msra.mxu0 %v5198_v3  ;;  %4038 = vmatprep.mubr.f32.mxu0 %v5308_v58  ;;  %v2519_v3 = vpop.permute.xlu0 %2518  ;;  %v2521_v27 = vpop.permute.xlu1 %2520 }
 0x4c5   :  { %4425 = vmatprep.subr.bf16.mxu0 %v5216_v26  ;;  %v2556_v22 = vand.u32 4294901760, %v2519_v3  ;;  %v2559_v30 = vand.u32 4294901760, %v2521_v27 }
 0x4c7   :  { %4039 = vmatmul.mubr.f32.gmra.mrb[6].mxu0 %v5290_v38  ;;  %v2710_v46 = vsub.f32 %v2519_v3, %v2556_v22 }
 0x4c8   :  { %4427 = vmatpush3.bf16.msra.mxu0 %v5216_v26  ;;  %4041 = vmatprep.mubr.f32.mxu0 %v5318_v49  ;;  %v2553_v26 = vand.u32 4294901760, %v2517_v41 }
 0x4c9   :  { %4429 = vmatprep.subr.bf16.mxu0 %v5234_v53  ;;  %v2711_v13 = vand.u32 4294901760, %v2710_v46 }
 0x4ca   :  { %v5381_v21 = vpack.c.bf16 %v2556_v22, %v2553_v26  ;;  %v2703_v6 = vsub.f32 %v2517_v41, %v2553_v26 }
 0x4cb   :  { %4042 = vmatmul.mubr.f32.gmra.mrb[8].mxu0 %v5324_v1  ;;  %v2712_v43 = vsub.f32 %v2710_v46, %v2711_v13 }
 0x4cc   :  { %4431 = vmatpush3.bf16.msra.mxu0 %v5234_v53  ;;  %4060 = vmatprep.mubr.f32.mxu0 %v5255_v52  ;;  %v2717_v53 = vsub.f32 %v2521_v27, %v2559_v30  ;;  %v2704_v4 = vand.u32 4294901760, %v2703_v6  ;;  %v5389_v15 = vpack.c.bf16 %v2710_v46, %v2703_v6 }
 0x4cd   :  { %4433 = vmatprep.subr.bf16.mxu0 %v5381_v21  ;;  %v2713_v19 = vand.u32 4294901760, %v2712_v43 }
 0x4ce   :  { %v2718_v20 = vand.u32 4294901760, %v2717_v53  ;;  %v5391_v34 = vpack.c.bf16 %v2711_v13, %v2704_v4 }
 0x4cf   :  { %4061 = vmatmul.mubr.f32.vlgmr.msra.gmra.mrb[2].mxu0 %v5248_v35  ;;  %v2523_v35 = vpop.permute.xlu1 %2522 }
 0x4d0   :  { %4063 = vmatprep.mubr.f32.mxu0 %v5271_v23  ;;  %4435 = vmatpush3.bf16.msra.mxu0 %v5381_v21  ;;  %v2562_v50 = vand.u32 4294901760, %v2523_v35  ;;  %v2719_v51 = vsub.f32 %v2717_v53, %v2718_v20 }
 0x4d2   :  { %v5385_v52 = vpack.c.bf16 %v2562_v50, %v2559_v30  ;;  %v2724_v17 = vsub.f32 %v2523_v35, %v2562_v50 }
 0x4d3   :  { %4064 = vmatmul.mubr.f32.gmra.mrb[4].mxu0 %v5267_v60  ;;  %v2705_v60 = vsub.f32 %v2703_v6, %v2704_v4 }
 0x4d4   :  { %4066 = vmatprep.mubr.f32.mxu0 %v5308_v58  ;;  %4437 = vmatprep.subr.bf16.mxu0 %v5385_v52  ;;  %v2725_v57 = vand.u32 4294901760, %v2724_v17  ;;  %v5393_v42 = vpack.c.bf16 %v2724_v17, %v2717_v53 }
 0x4d5   :  { %4439 = vmatpush3.bf16.msra.mxu0 %v5385_v52  ;;  %v2706_v7 = vand.u32 4294901760, %v2705_v60 }
 0x4d6   :  { %v2726_v23 = vsub.f32 %v2724_v17, %v2725_v57  ;;  %v5395_v39 = vpack.c.bf16 %v2725_v57, %v2718_v20 }
 0x4d7   :  { %4067 = vmatmul.mubr.f32.gmra.mrb[6].mxu0 %v5290_v38  ;;  %v4440_v24 = vpack.c.bf16 %v2713_v19, %v2706_v7  ;;  %v2720_v38 = vand.u32 4294901760, %v2719_v51 }
 0x4d8   :  { %4069 = vmatprep.mubr.f32.mxu0 %v5318_v49  ;;  %v2727_v28 = vand.u32 4294901760, %v2726_v23 }
 0x4d9   :  { %4441 = vmatprep.subr.bf16.mxu0 %v4440_v24 }
 0x4da   :  { %v5397_v40 = vpack.c.bf16 %v2727_v28, %v2720_v38 }
 0x4db   :  { %4070 = vmatmul.mubr.f32.gmra.mrb[8].mxu0 %v5324_v1 }
 0x563   :  { %v3922_v25 = vpop.f32.mrb[10].mxu1 }
 0x564   :  { %v1753_v61 = vpop.f32.mrb[11].mxu1 }
 0x568   :  { %v3925_v9 = vpop.f32.mrb[12].mxu1 }
 0x569   :  { %v1773_v10 = vpop.f32.mrb[13].mxu1 }
 0x570   :  { %v3928_v45 = vpop.f32.mrb[14].mxu1 }
 0x571   :  { %v1793_v11 = vpop.f32.mrb[15].mxu1 }
 0x576   :  { %v3931_v31 = vpop.f32.mrb[16].mxu1 }
 0x577   :  { %v1813_v44 = vpop.f32.mrb[17].mxu1 }
 0x5a2   :  { %v4062_v8 = vpop.f32.mrb[2].mxu0 }
 0x5a3   :  { %v4484_v58 = vadd.f32 %v4062_v8, %v3922_v25  ;;  %v2466_v12 = vpop.f32.mrb[3].mxu0 }
 0x5a4   :  { %v4485_v55 = vadd.f32 %v2466_v12, %v1753_v61 }
 0x5a5   :  { %v2532_v32 = vsel %vm5558_vm1, %v4484_v58, 0 }
 0x5a6   :  { %v5400_v14 = vand.u32 4294901760, %v2532_v32  ;;  %v2529_v47 = vsel %vm5559_vm8, %v4485_v55, 0  ;;  %v4065_v54 = vpop.f32.mrb[4].mxu0 }
 0x5a7   :  { %v5403_v49 = vand.u32 4294901760, %v2529_v47  ;;  %v4486_v18 = vadd.f32 %v4065_v54, %v3925_v9  ;;  %v2478_v16 = vpop.f32.mrb[5].mxu0 }
 0x5a8   :  { %v5406_v36 = vsub.f32 %v2532_v32, %v5400_v14  ;;  %v4487_v0 = vadd.f32 %v2478_v16, %v1773_v10 }
 0x5a9   :  { %v5409_v1 = vsub.f32 %v2529_v47, %v5403_v49  ;;  %v2538_v2 = vsel %vm5560_vm14, %v4486_v18, 0 }
 0x5aa   :  { %v2633_v5 = vand.u32 4294901760, %v5406_v36  ;;  %v5413_v62 = vand.u32 4294901760, %v2538_v2  ;;  %v2535_v33 = vsel %vm5561_vm0, %v4487_v0, 0  ;;  %v4068_v59 = vpop.f32.mrb[6].mxu0 }
 0x5ab   :  { %v5416_v48 = vand.u32 4294901760, %v2535_v33  ;;  %v4488_v29 = vadd.f32 %v4068_v59, %v3928_v45  ;;  %v2490_v56 = vpop.f32.mrb[7].mxu0  ;;  %v2623_v37 = vand.u32 4294901760, %v5409_v1 }
 0x5ac   :  { %v2634_v63 = vsub.f32 %v5406_v36, %v2633_v5  ;;  %v5423_v41 = vsub.f32 %v2538_v2, %v5413_v62  ;;  %v4489_v3 = vadd.f32 %v2490_v56, %v1793_v11 }
 0x5ad   :  { %v5426_v26 = vsub.f32 %v2535_v33, %v5416_v48  ;;  %v2544_v22 = vsel %vm5562_vm3, %v4488_v29, 0  ;;  %v2624_v27 = vsub.f32 %v5409_v1, %v2623_v37 }
 0x5ae   :  { %v2541_v30 = vsel %vm5563_vm5, %v4489_v3, 0  ;;  %v4071_v53 = vpop.f32.mrb[8].mxu0  ;;  %v2635_v4 = vand.u32 4294901760, %v2634_v63  ;;  %v5436_v13 = vand.u32 4294901760, %v2544_v22  ;;  %v2653_v60 = vand.u32 4294901760, %v5423_v41 }
 0x5af   :  { %v5433_v35 = vand.u32 4294901760, %v2541_v30  ;;  %v4490_v50 = vadd.f32 %v4071_v53, %v3931_v31  ;;  %v2502_v17 = vpop.f32.mrb[9].mxu0  ;;  %v2625_v6 = vand.u32 4294901760, %v2624_v27  ;;  %v2643_v46 = vand.u32 4294901760, %v5426_v26 }
 0x5b0   :  { %v4491_v57 = vadd.f32 %v2502_v17, %v1813_v44  ;;  %v2672_v28 = vsub.f32 %v2544_v22, %v5436_v13  ;;  %v2654_v38 = vsub.f32 %v5423_v41, %v2653_v60 }
 0x5b1   :  { %v5440_v43 = vsub.f32 %v2541_v30, %v5433_v35  ;;  %4080 = vmatprep.mubr.f32.mxu0 %v2625_v6  ;;  %v2644_v20 = vsub.f32 %v5426_v26, %v2643_v46  ;;  %v2550_v25 = vsel %vm5565_vm13, %v4490_v50, 0 }
 0x5b2   :  { %v2547_v23 = vsel %vm5564_vm7, %v4491_v57, 0  ;;  %4081 = vmatmul.mubr.f32.vlgmr.msra.gmra.mrb[10].mxu0 %v2635_v4  ;;  %v2655_v10 = vand.u32 4294901760, %v2654_v38  ;;  %v2673_v45 = vand.u32 4294901760, %v2672_v28 }
 0x5b3   :  { %v5446_v51 = vand.u32 4294901760, %v2547_v23  ;;  %4443 = vmatpush3.bf16.msra.mxu0 %v4440_v24  ;;  %v2645_v7 = vand.u32 4294901760, %v2644_v20  ;;  %v2663_v19 = vand.u32 4294901760, %v5440_v43  ;;  %v5458_v24 = vand.u32 4294901760, %v2550_v25 }
 0x5b4   :  { %4445 = vmatprep.subr.bf16.mxu0 %v5397_v40  ;;  %v2674_v8 = vsub.f32 %v2672_v28, %v2673_v45 }
 0x5b5   :  { %v2682_v61 = vsub.f32 %v2547_v23, %v5446_v51  ;;  %4083 = vmatprep.mubr.f32.mxu0 %v2645_v7  ;;  %v2664_v9 = vsub.f32 %v5440_v43, %v2663_v19  ;;  %v2692_v44 = vsub.f32 %v2550_v25, %v5458_v24 }
 0x5b6   :  { %v2675_v12 = vand.u32 4294901760, %v2674_v8 }
 0x5b7   :  { %4447 = vmatpush3.bf16.msra.mxu0 %v5397_v40  ;;  %v2665_v11 = vand.u32 4294901760, %v2664_v9  ;;  %v2683_v31 = vand.u32 4294901760, %v2682_v61  ;;  %v2693_v55 = vand.u32 4294901760, %v2692_v44 }
 0x5b8   :  { %4449 = vmatprep.subr.bf16.mxu0 %v5389_v15 }
 0x5b9   :  { %v2684_v58 = vsub.f32 %v2682_v61, %v2683_v31  ;;  %v2694_v40 = vsub.f32 %v2692_v44, %v2693_v55 }
 0x5ba   :  { %4084 = vmatmul.mubr.f32.gmra.mrb[10].mxu0 %v2655_v10 }
 0x5bb   :  { %4086 = vmatprep.mubr.f32.mxu0 %v2665_v11  ;;  %v2685_v32 = vand.u32 4294901760, %v2684_v58  ;;  %v2695_v47 = vand.u32 4294901760, %v2694_v40 }
 0x5c2   :  { %4087 = vmatmul.mubr.f32.gmra.mrb[10].mxu0 %v2675_v12 }
 0x5c3   :  { %4089 = vmatprep.mubr.f32.mxu0 %v2685_v32 }
 0x5ca   :  { %4090 = vmatmul.mubr.f32.gmra.mrb[10].mxu0 %v2695_v47 }
 0x5cb   :  { %4100 = vmatprep.mubr.f32.mxu0 %v5403_v49 }
 0x5d2   :  { %4101 = vmatmul.mubr.f32.vlgmr.msra.gmra.mrb[10].mxu0 %v5400_v14 }
 0x5d3   :  { %4451 = vmatpush3.bf16.msra.mxu0 %v5389_v15  ;;  %4103 = vmatprep.mubr.f32.mxu0 %v5416_v48 }
 0x5d4   :  { %4453 = vmatprep.subr.bf16.mxu0 %v5393_v42 }
 0x5d7   :  { %4455 = vmatpush3.bf16.msra.mxu0 %v5393_v42 }
 0x5d8   :  { %4457 = vmatprep.subr.bf16.mxu0 %v5381_v21 }
 0x5da   :  { %4104 = vmatmul.mubr.f32.gmra.mrb[10].mxu0 %v5413_v62 }
 0x5db   :  { %4106 = vmatprep.mubr.f32.mxu0 %v5433_v35 }
 0x5e2   :  { %4107 = vmatmul.mubr.f32.gmra.mrb[10].mxu0 %v5436_v13 }
 0x5e3   :  { %4109 = vmatprep.mubr.f32.mxu0 %v5446_v51 }
 0x5ea   :  { %4110 = vmatmul.mubr.f32.gmra.mrb[10].mxu0 %v5458_v24 }
 0x5eb   :  { %4120 = vmatprep.mubr.f32.mxu0 %v5409_v1 }
 0x5f2   :  { %4121 = vmatmul.mubr.f32.vlgmr.msra.gmra.mrb[10].mxu0 %v5406_v36 }
 0x5f3   :  { %4459 = vmatpush3.bf16.msra.mxu0 %v5381_v21  ;;  %4123 = vmatprep.mubr.f32.mxu0 %v5426_v26 }
 0x5f4   :  { %4461 = vmatprep.subr.bf16.mxu0 %v5385_v52 }
 0x5f7   :  { %4463 = vmatpush3.bf16.msra.mxu0 %v5385_v52 }
 0x5f8   :  { %4465 = vmatprep.subr.bf16.mxu0 %v5391_v34 }
 0x5fa   :  { %4124 = vmatmul.mubr.f32.gmra.mrb[10].mxu0 %v5423_v41 }
 0x5fb   :  { %4126 = vmatprep.mubr.f32.mxu0 %v5440_v43 }
 0x602   :  { %4127 = vmatmul.mubr.f32.gmra.mrb[10].mxu0 %v2672_v28 }
 0x603   :  { %4129 = vmatprep.mubr.f32.mxu0 %v2682_v61 }
 0x60a   :  { %4130 = vmatmul.mubr.f32.gmra.mrb[10].mxu0 %v2692_v44 }
 0x60b   :  { %4140 = vmatprep.mubr.f32.mxu0 %v2623_v37 }
 0x612   :  { %4141 = vmatmul.mubr.f32.vlgmr.msra.gmra.mrb[10].mxu0 %v2633_v5 }
 0x613   :  { %4467 = vmatpush3.bf16.msra.mxu0 %v5391_v34  ;;  %4143 = vmatprep.mubr.f32.mxu0 %v2643_v46 }
 0x614   :  { %4469 = vmatprep.subr.bf16.mxu0 %v5395_v39 }
 0x617   :  { %4471 = vmatpush3.bf16.msra.mxu0 %v5395_v39 }
 0x618   :  { %4473 = vmatprep.subr.bf16.mxu0 %v5381_v21 }
 0x61a   :  { %4144 = vmatmul.mubr.f32.gmra.mrb[10].mxu0 %v2653_v60 }
 0x61b   :  { %4146 = vmatprep.mubr.f32.mxu0 %v2663_v19 }
 0x622   :  { %4147 = vmatmul.mubr.f32.gmra.mrb[10].mxu0 %v2673_v45 }
 0x623   :  { %4149 = vmatprep.mubr.f32.mxu0 %v2683_v31 }
 0x62a   :  { %4150 = vmatmul.mubr.f32.gmra.mrb[10].mxu0 %v2693_v55 }
 0x62b   :  { %4160 = vmatprep.mubr.f32.mxu0 %v5403_v49 }
 0x632   :  { %4161 = vmatmul.mubr.f32.vlgmr.msra.gmra.mrb[10].mxu0 %v5400_v14 }
 0x633   :  { %4475 = vmatpush3.bf16.msra.mxu0 %v5381_v21  ;;  %4163 = vmatprep.mubr.f32.mxu0 %v5416_v48  ;;  %v3345_v21 = vpop.permute.xlu0 %3344 }
 0x634   :  { %4477 = vmatprep.subr.bf16.mxu0 %v5385_v52 }
 0x637   :  { %4479 = vmatpush3.bf16.msra.mxu0 %v5385_v52 }
 0x63a   :  { %4164 = vmatmul.mubr.f32.gmra.mrb[10].mxu0 %v5413_v62 }
 0x63b   :  { %4166 = vmatprep.mubr.f32.mxu0 %v5433_v35 }
 0x642   :  { %4167 = vmatmul.mubr.f32.gmra.mrb[10].mxu0 %v5436_v13 }
 0x643   :  { %4169 = vmatprep.mubr.f32.mxu0 %v5446_v51 }
 0x64a   :  { %4170 = vmatmul.mubr.f32.gmra.mrb[10].mxu0 %v5458_v24 }
 0x64b   :  { %4180 = vmatprep.mubr.f32.mxu0 %v5403_v49 }
 0x652   :  { %4181 = vmatmul.mubr.f32.vlgmr.msra.gmra.mrb[10].mxu0 %v5400_v14 }
 0x653   :  { %4183 = vmatprep.mubr.f32.mxu0 %v5416_v48 }
 0x65a   :  { %4184 = vmatmul.mubr.f32.gmra.mrb[10].mxu0 %v5413_v62 }
 0x65b   :  { %4186 = vmatprep.mubr.f32.mxu0 %v5433_v35 }
 0x662   :  { %4187 = vmatmul.mubr.f32.gmra.mrb[10].mxu0 %v5436_v13 }
 0x663   :  { %4189 = vmatprep.mubr.f32.mxu0 %v5446_v51 }
 0x66a   :  { %4190 = vmatmul.mubr.f32.gmra.mrb[10].mxu0 %v5458_v24 }
 0x73d   :  { %v4191_v52 = vpop.f32.mrb[10].mxu0 }
 0x73e   :  { %v3348_v15 = vadd.f32 %v4191_v52, %v3345_v21  ;;  %v3328_v34 = vpop.f32.mrb[11].mxu0 }
 0x73f   :  { %v3347_v42 = vadd.f32 %v3345_v21, %v3328_v34 }
 0x740   :  { %3350 = vst.msk [vmem:[#allocation7 + $0x8] sm:$0xff] %vm5566_vm15, %v3348_v15 }
 0x741   :  { %3349 = vst.msk [vmem:[#allocation7] sm:$0xff] %vm5567_vm9, %v3347_v42 }
 0x742   :  { %4713 = shalt.err (!%p4710_p6)
}
 0x743   :  { %s4714_s18 = scalar_lea.hbm %s5534_s3, 256 }
 0x744   :  { %p4715_p7 = scmp.ne.s32.totalorder %s5534_s3, %s4714_s18  ;;  %p4718_p8 = scmp.lt.u32.totalorder %s4714_s18, %s5534_s3 }
 0x746   :  { %p4720_p9 = pnand %p4718_p8, %p4715_p7 }
 0x748   :  { %4723 = shalt.err (!%p4720_p9)
}
 0x749   :  { %3362 = dma.vmem_to_hbm [thread:$0]  %s3357_s14, 256, %s5534_s3, [#allocation4], %s4731_s22, %s4731_s22, %s4732_s23  }
 0x74a   :  { %4728 = dma.done.wait [#allocation4], 256  }
 0x74b   :  { %4729 = vsyncadd [#allocation4], 4294967040 }
 0x74c   :  { %3366 = vsyncpa [#allocation3], 1 }
 0x74d   :  { %3367 = vsyncpa [#allocation6], 1 }
 0x74e   :  { %3368 = vsyncpa [#allocation4], 1 }

</bundles_post_ra>
